<compile_context>
chip_gen: v6e
topology: v6e:2x2x1
jax: 0.10.0
libtpu: 0.0.40
codegen_flags: <defaults>
</compile_context>

<pallas_src>
import jax
import jax.numpy as jnp
from jax import lax
from jax.experimental import pallas as pl
from jax.experimental.pallas import tpu as pltpu

# Hyperparameters from the PyTorch `args` dict.
NUM_WORDS = 200
EMBED_DIM = 64
HIDDEN = 32
NUM_CLASSES = 2
QUERY_LEN = 10
K = 5


def mvlstm_kernel(x_ref, wih_ref, whh_ref, b_ref, lstrict_ref, ustrict_ref,
                  linw_ref, linb_ref, out_ref):
    T = QUERY_LEN
    H = HIDDEN
    H2 = 2 * H
    C = NUM_CLASSES

    whh = whh_ref[...]                                   # (2H, 8H) block-diag recurrent weights

    # Fused input projection for all 4 recurrences.
    # x rows (interleaved): row 2s = [xq[s] | xq[T-1-s]], row 2s+1 = [xd[s] | xd[T-1-s]].
    # Gate-column layout of the 8H axis: [i_f, i_b, f_f, f_b, g_f, g_b, o_f, o_b] (H each).
    gx = jnp.dot(x_ref[...], wih_ref[...],
                 preferred_element_type=jnp.float32) + b_ref[...]        # (2T, 8H)

    # Fused BiLSTM recurrence. State block (2, 2H): row0 = query [fwd|bwd], row1 = doc [fwd|bwd].
    h = jnp.zeros((2, H2), jnp.float32)
    c = jnp.zeros((2, H2), jnp.float32)

    # Per-time-step hidden states accumulated in vregs (no VMEM scratch).
    hq_f = jnp.zeros((T, H), jnp.float32)
    hq_b = jnp.zeros((T, H), jnp.float32)
    hd_f = jnp.zeros((T, H), jnp.float32)
    hd_b = jnp.zeros((T, H), jnp.float32)
    row_ids = lax.broadcasted_iota(jnp.int32, (T, 1), 0)

    for s in range(T):  # static unroll (T = 10)
        g = gx[2 * s:2 * s + 2, :] + jnp.dot(h, whh,
                                             preferred_element_type=jnp.float32)  # (2, 8H)
        i_g = jax.nn.sigmoid(g[:, 0:H2])           # [fwd | bwd] input gates
        f_g = jax.nn.sigmoid(g[:, H2:2 * H2])      # forget gates
        g_g = jnp.tanh(g[:, 2 * H2:3 * H2])        # cell candidates
        o_g = jax.nn.sigmoid(g[:, 3 * H2:4 * H2])  # output gates
        c = f_g * c + i_g * g_g
        h = o_g * jnp.tanh(c)

        # fwd halves belong to time s, bwd halves to time T-1-s.
        hq_f = jnp.where(row_ids == s, h[0:1, 0:H], hq_f)
        hd_f = jnp.where(row_ids == s, h[1:2, 0:H], hd_f)
        hq_b = jnp.where(row_ids == (T - 1 - s), h[0:1, H:H2], hq_b)
        hd_b = jnp.where(row_ids == (T - 1 - s), h[1:2, H:H2], hd_b)

    # F.normalize(dim=-1), eps = 1e-12, over the concatenated [fwd|bwd] features.
    def inv_norm_scale(a, b):
        n = jnp.sqrt(jnp.sum(a * a, axis=1, keepdims=True) +
                     jnp.sum(b * b, axis=1, keepdims=True))
        return jnp.maximum(n, 1e-12)

    nq = inv_norm_scale(hq_f, hq_b)
    nd = inv_norm_scale(hd_f, hd_b)
    qf, qb = hq_f / nq, hq_b / nq
    df, db = hd_f / nd, hd_b / nd

    # Similarity on the MXU: S[i, j] = qn[i] . dn[j]  (sum of the two direction halves).
    nt = (((1,), (1,)), ((), ()))
    S = (lax.dot_general(qf, df, nt, preferred_element_type=jnp.float32) +
         lax.dot_general(qb, db, nt, preferred_element_type=jnp.float32))   # (T, T)

    # k-max pooling over the row-major flattening of S, preserving original order.
    vm = S
    for _ in range(K - 1):  # static unroll (K = 5)
        m = jnp.max(vm)
        vm = jnp.where(vm >= m, -jnp.inf, vm)
    thresh = jnp.max(vm)                              # K-th largest value
    sel = (S >= thresh).astype(jnp.float32)           # selection mask (T, T)
    # TODO(synk): with exact duplicate values `sel` can mark >K entries (torch.topk
    # tie-breaking is not reproduced); vanishingly unlikely for float activations.

    # Exclusive prefix count of selected entries in row-major order (MXU against
    # host-precomputed strict triangular constants).
    row_cnt = jnp.sum(sel, axis=1, keepdims=True)                              # (T, 1)
    prev_rows = jnp.dot(lstrict_ref[...], row_cnt,
                        preferred_element_type=jnp.float32)                    # (T, 1)
    within = jnp.dot(sel, ustrict_ref[...],
                     preferred_element_type=jnp.float32)                       # (T, T)
    pos = prev_rows + within            # rank (0..K-1) of each selected entry

    # Gather the K kept values in original order and fuse the final Linear(K -> C).
    m_vals = sel * S
    acc = jnp.zeros((1, C), jnp.float32)
    for p in range(K):  # static unroll
        val = jnp.sum(m_vals * (jnp.abs(pos - float(p)) < 0.5).astype(jnp.float32))
        acc = acc + val * linw_ref[p:p + 1, :]
    out_ref[...] = acc + linb_ref[...]


def init_params(key):
    ks = jax.random.split(key, 11)
    bound = 1.0 / (HIDDEN ** 0.5)

    def u(k, shape, b):
        return jax.random.uniform(k, shape, jnp.float32, -b, b)

    emb = jax.random.normal(ks[0], (NUM_WORDS, EMBED_DIM), jnp.float32)
    # PyTorch LSTM layout: (4H, E) / (4H, H) / (4H,) with gate order [i, f, g, o].
    return dict(
        emb=emb,
        w_ih_f=u(ks[1], (4 * HIDDEN, EMBED_DIM), bound),
        w_hh_f=u(ks[2], (4 * HIDDEN, HIDDEN), bound),
        b_ih_f=u(ks[3], (4 * HIDDEN,), bound),
        b_hh_f=u(ks[4], (4 * HIDDEN,), bound),
        w_ih_b=u(ks[5], (4 * HIDDEN, EMBED_DIM), bound),
        w_hh_b=u(ks[6], (4 * HIDDEN, HIDDEN), bound),
        b_ih_b=u(ks[7], (4 * HIDDEN,), bound),
        b_hh_b=u(ks[8], (4 * HIDDEN,), bound),
        lin_w=u(ks[9], (NUM_CLASSES, K), 1.0 / (K ** 0.5)),
        lin_b=u(ks[10], (NUM_CLASSES,), 1.0 / (K ** 0.5)),
    )


def _pack_weights(p):
    """Pack PyTorch-layout BiLSTM weights into fused block-diagonal matrices.

    Combined gate-column layout (8H): [i_f, i_b, f_f, f_b, g_f, g_b, o_f, o_b].
    """
    H, E = HIDDEN, EMBED_DIM

    def gate_blocks(w):  # (4H, X) -> 4 blocks (X, H) in [i, f, g, o] order
        return [w[g * H:(g + 1) * H, :].T for g in range(4)]

    ihf, ihb = gate_blocks(p['w_ih_f']), gate_blocks(p['w_ih_b'])
    hhf, hhb = gate_blocks(p['w_hh_f']), gate_blocks(p['w_hh_b'])
    zE = jnp.zeros((E, H), jnp.float32)
    zH = jnp.zeros((H, H), jnp.float32)

    wih_bd = jnp.concatenate([
        jnp.concatenate([blk for g in range(4) for blk in (ihf[g], zE)], axis=1),
        jnp.concatenate([blk for g in range(4) for blk in (zE, ihb[g])], axis=1),
    ], axis=0)                                                    # (2E, 8H)
    whh_bd = jnp.concatenate([
        jnp.concatenate([blk for g in range(4) for blk in (hhf[g], zH)], axis=1),
        jnp.concatenate([blk for g in range(4) for blk in (zH, hhb[g])], axis=1),
    ], axis=0)                                                    # (2H, 8H)

    bf = p['b_ih_f'] + p['b_hh_f']
    bb = p['b_ih_b'] + p['b_hh_b']
    b_cat = jnp.concatenate(
        [x for g in range(4) for x in (bf[g * H:(g + 1) * H], bb[g * H:(g + 1) * H])]
    ).reshape(1, 8 * H)                                           # (1, 8H)

    linw = p['lin_w'].T                                           # (K, C)
    linb = p['lin_b'].reshape(1, NUM_CLASSES)                     # (1, C)
    return wih_bd, whh_bd, b_cat, linw, linb


@jax.jit
def mvlstm_forward(q_idx, d_idx, params):
    T, E = QUERY_LEN, EMBED_DIM

    # Embedding lookup (plain JAX gather); batch dim (=1) squeezed.
    xq = params['emb'][q_idx[0]]   # (T, E)
    xd = params['emb'][d_idx[0]]   # (T, E)

    # Interleave q/d rows and append time-reversed copies for the backward halves:
    # row 2s = [xq[s] | xq[T-1-s]], row 2s+1 = [xd[s] | xd[T-1-s]].
    x_fwd = jnp.stack([xq, xd], axis=1).reshape(2 * T, E)
    x_bwd = jnp.stack([xq[::-1], xd[::-1]], axis=1).reshape(2 * T, E)
    x_cat = jnp.concatenate([x_fwd, x_bwd], axis=1)               # (2T, 2E)

    wih_bd, whh_bd, b_cat, linw, linb = _pack_weights(params)

    # Host-precomputed strict triangular constants for the row-major prefix count.
    idx = jnp.arange(T)
    lstrict = (idx[:, None] > idx[None, :]).astype(jnp.float32)   # (T, T)
    ustrict = (idx[:, None] < idx[None, :]).astype(jnp.float32)   # (T, T)

    n_in = 8
    in_specs = [pl.BlockSpec(memory_space=pltpu.MemorySpace.VMEM) for _ in range(n_in)]
    out_spec = pl.BlockSpec(memory_space=pltpu.MemorySpace.VMEM)

    return pl.pallas_call(
        mvlstm_kernel,
        out_shape=jax.ShapeDtypeStruct((1, NUM_CLASSES), jnp.float32),
        in_specs=in_specs,
        out_specs=out_spec,
    )(x_cat, wih_bd, whh_bd, b_cat, lstrict, ustrict, linw, linb)


if __name__ == "__main__":
    key = jax.random.PRNGKey(0)
    kp, kq, kd = jax.random.split(key, 3)
    params = init_params(kp)
    q_idx = jax.random.randint(kq, (1, QUERY_LEN), 0, NUM_WORDS, dtype=jnp.int32)
    d_idx = jax.random.randint(kd, (1, QUERY_LEN), 0, NUM_WORDS, dtype=jnp.int32)

    out = mvlstm_forward(q_idx, d_idx, params)
    jax.block_until_ready(out)
    assert out.shape == (1, NUM_CLASSES)
    print("KERNEL_OK")
</pallas_src>

<mosaic_0001>
module attributes {stable_mosaic.version = 11 : i64} {
  func.func @mvlstm_kernel(%arg0: memref<20x128xf32, #tpu.memory_space<vmem>>, %arg1: memref<128x256xf32, #tpu.memory_space<vmem>>, %arg2: memref<64x256xf32, #tpu.memory_space<vmem>>, %arg3: memref<1x256xf32, #tpu.memory_space<vmem>>, %arg4: memref<10x10xf32, #tpu.memory_space<vmem>>, %arg5: memref<10x10xf32, #tpu.memory_space<vmem>>, %arg6: memref<5x2xf32, #tpu.memory_space<vmem>>, %arg7: memref<1x2xf32, #tpu.memory_space<vmem>>, %arg8: memref<1x2xf32, #tpu.memory_space<vmem>>) attributes {dimension_semantics = [], scalar_prefetch = 0 : i64, scratch_operands = 0 : i64, tpu.core_type = #tpu.core_type<tc>} {
    %c0 = arith.constant 0 : index
    %c0_0 = arith.constant 0 : index
    %0 = vector.load %arg2[%c0, %c0_0] : memref<64x256xf32, #tpu.memory_space<vmem>>, vector<64x256xf32>
    %c0_1 = arith.constant 0 : index
    %c0_2 = arith.constant 0 : index
    %1 = vector.load %arg0[%c0_1, %c0_2] : memref<20x128xf32, #tpu.memory_space<vmem>>, vector<20x128xf32>
    %c0_3 = arith.constant 0 : index
    %c0_4 = arith.constant 0 : index
    %2 = vector.load %arg1[%c0_3, %c0_4] : memref<128x256xf32, #tpu.memory_space<vmem>>, vector<128x256xf32>
    %cst = arith.constant dense<0.000000e+00> : vector<20x256xf32>
    %3 = tpu.matmul %1, %2, %cst {dimension_numbers = #tpu.dot_dimension_numbers<[1], [0], [0], [1], [0, 0, 1, 1], [], []>} : vector<20x128xf32>, vector<128x256xf32>, vector<20x256xf32> -> vector<20x256xf32>
    %c0_5 = arith.constant 0 : index
    %c0_6 = arith.constant 0 : index
    %4 = vector.load %arg3[%c0_5, %c0_6] : memref<1x256xf32, #tpu.memory_space<vmem>>, vector<1x256xf32>
    %5 = vector.broadcast %4 : vector<1x256xf32> to vector<20x256xf32>
    %6 = arith.addf %3, %5 : vector<20x256xf32>
    %cst_7 = arith.constant 0.000000e+00 : f32
    %7 = vector.broadcast %cst_7 : f32 to vector<2x64xf32>
    %cst_8 = arith.constant 0.000000e+00 : f32
    %8 = vector.broadcast %cst_8 : f32 to vector<2x64xf32>
    %cst_9 = arith.constant 0.000000e+00 : f32
    %9 = vector.broadcast %cst_9 : f32 to vector<10x32xf32>
    %cst_10 = arith.constant 0.000000e+00 : f32
    %10 = vector.broadcast %cst_10 : f32 to vector<10x32xf32>
    %cst_11 = arith.constant 0.000000e+00 : f32
    %11 = vector.broadcast %cst_11 : f32 to vector<10x32xf32>
    %cst_12 = arith.constant 0.000000e+00 : f32
    %12 = vector.broadcast %cst_12 : f32 to vector<10x32xf32>
    %13 = tpu.iota {dimensions = array<i32: 0>} : vector<10x1xi32>
    %14 = vector.extract_strided_slice %6 {offsets = [0, 0], sizes = [2, 256], strides = [1, 1]} : vector<20x256xf32> to vector<2x256xf32>
    %cst_13 = arith.constant dense<0.000000e+00> : vector<2x256xf32>
    %15 = tpu.matmul %7, %0, %cst_13 {dimension_numbers = #tpu.dot_dimension_numbers<[1], [0], [0], [1], [0, 0, 1, 1], [], []>} : vector<2x64xf32>, vector<64x256xf32>, vector<2x256xf32> -> vector<2x256xf32>
    %16 = arith.addf %14, %15 : vector<2x256xf32>
    %17 = vector.extract_strided_slice %16 {offsets = [0, 0], sizes = [2, 64], strides = [1, 1]} : vector<2x256xf32> to vector<2x64xf32>
    %18 = arith.negf %17 : vector<2x64xf32>
    %19 = math.exp %18 : vector<2x64xf32>
    %cst_14 = arith.constant 1.000000e+00 : f32
    %20 = vector.broadcast %cst_14 : f32 to vector<2x64xf32>
    %21 = arith.addf %20, %19 : vector<2x64xf32>
    %22 = arith.divf %20, %21 : vector<2x64xf32>
    %23 = vector.extract_strided_slice %16 {offsets = [0, 64], sizes = [2, 64], strides = [1, 1]} : vector<2x256xf32> to vector<2x64xf32>
    %24 = arith.negf %23 : vector<2x64xf32>
    %25 = math.exp %24 : vector<2x64xf32>
    %cst_15 = arith.constant 1.000000e+00 : f32
    %26 = vector.broadcast %cst_15 : f32 to vector<2x64xf32>
    %27 = arith.addf %26, %25 : vector<2x64xf32>
    %28 = arith.divf %26, %27 : vector<2x64xf32>
    %29 = vector.extract_strided_slice %16 {offsets = [0, 128], sizes = [2, 64], strides = [1, 1]} : vector<2x256xf32> to vector<2x64xf32>
    %30 = math.tanh %29 : vector<2x64xf32>
    %31 = vector.extract_strided_slice %16 {offsets = [0, 192], sizes = [2, 64], strides = [1, 1]} : vector<2x256xf32> to vector<2x64xf32>
    %32 = arith.negf %31 : vector<2x64xf32>
    %33 = math.exp %32 : vector<2x64xf32>
    %cst_16 = arith.constant 1.000000e+00 : f32
    %34 = vector.broadcast %cst_16 : f32 to vector<2x64xf32>
    %35 = arith.addf %34, %33 : vector<2x64xf32>
    %36 = arith.divf %34, %35 : vector<2x64xf32>
    %37 = arith.mulf %28, %8 : vector<2x64xf32>
    %38 = arith.mulf %22, %30 : vector<2x64xf32>
    %39 = arith.addf %37, %38 : vector<2x64xf32>
    %40 = math.tanh %39 : vector<2x64xf32>
    %41 = arith.mulf %36, %40 : vector<2x64xf32>
    %c0_i32 = arith.constant 0 : i32
    %42 = vector.broadcast %c0_i32 : i32 to vector<10x1xi32>
    %43 = arith.cmpi eq, %13, %42 : vector<10x1xi32>
    %44 = vector.extract_strided_slice %41 {offsets = [0, 0], sizes = [1, 32], strides = [1, 1]} : vector<2x64xf32> to vector<1x32xf32>
    %45 = vector.shape_cast %43 : vector<10x1xi1> to vector<10x1xi1>
    %46 = vector.broadcast %45 : vector<10x1xi1> to vector<10x32xi1>
    %47 = vector.shape_cast %44 : vector<1x32xf32> to vector<1x32xf32>
    %48 = vector.broadcast %47 : vector<1x32xf32> to vector<10x32xf32>
    %49 = arith.select %46, %48, %9 : vector<10x32xi1>, vector<10x32xf32>
    %c0_i32_17 = arith.constant 0 : i32
    %50 = vector.broadcast %c0_i32_17 : i32 to vector<10x1xi32>
    %51 = arith.cmpi eq, %13, %50 : vector<10x1xi32>
    %52 = vector.extract_strided_slice %41 {offsets = [1, 0], sizes = [1, 32], strides = [1, 1]} : vector<2x64xf32> to vector<1x32xf32>
    %53 = vector.shape_cast %51 : vector<10x1xi1> to vector<10x1xi1>
    %54 = vector.broadcast %53 : vector<10x1xi1> to vector<10x32xi1>
    %55 = vector.shape_cast %52 : vector<1x32xf32> to vector<1x32xf32>
    %56 = vector.broadcast %55 : vector<1x32xf32> to vector<10x32xf32>
    %57 = arith.select %54, %56, %11 : vector<10x32xi1>, vector<10x32xf32>
    %c9_i32 = arith.constant 9 : i32
    %58 = vector.broadcast %c9_i32 : i32 to vector<10x1xi32>
    %59 = arith.cmpi eq, %13, %58 : vector<10x1xi32>
    %60 = vector.extract_strided_slice %41 {offsets = [0, 32], sizes = [1, 32], strides = [1, 1]} : vector<2x64xf32> to vector<1x32xf32>
    %61 = vector.shape_cast %59 : vector<10x1xi1> to vector<10x1xi1>
    %62 = vector.broadcast %61 : vector<10x1xi1> to vector<10x32xi1>
    %63 = vector.shape_cast %60 : vector<1x32xf32> to vector<1x32xf32>
    %64 = vector.broadcast %63 : vector<1x32xf32> to vector<10x32xf32>
    %65 = arith.select %62, %64, %10 : vector<10x32xi1>, vector<10x32xf32>
    %c9_i32_18 = arith.constant 9 : i32
    %66 = vector.broadcast %c9_i32_18 : i32 to vector<10x1xi32>
    %67 = arith.cmpi eq, %13, %66 : vector<10x1xi32>
    %68 = vector.extract_strided_slice %41 {offsets = [1, 32], sizes = [1, 32], strides = [1, 1]} : vector<2x64xf32> to vector<1x32xf32>
    %69 = vector.shape_cast %67 : vector<10x1xi1> to vector<10x1xi1>
    %70 = vector.broadcast %69 : vector<10x1xi1> to vector<10x32xi1>
    %71 = vector.shape_cast %68 : vector<1x32xf32> to vector<1x32xf32>
    %72 = vector.broadcast %71 : vector<1x32xf32> to vector<10x32xf32>
    %73 = arith.select %70, %72, %12 : vector<10x32xi1>, vector<10x32xf32>
    %74 = vector.extract_strided_slice %6 {offsets = [2, 0], sizes = [2, 256], strides = [1, 1]} : vector<20x256xf32> to vector<2x256xf32>
    %cst_19 = arith.constant dense<0.000000e+00> : vector<2x256xf32>
    %75 = tpu.matmul %41, %0, %cst_19 {dimension_numbers = #tpu.dot_dimension_numbers<[1], [0], [0], [1], [0, 0, 1, 1], [], []>} : vector<2x64xf32>, vector<64x256xf32>, vector<2x256xf32> -> vector<2x256xf32>
    %76 = arith.addf %74, %75 : vector<2x256xf32>
    %77 = vector.extract_strided_slice %76 {offsets = [0, 0], sizes = [2, 64], strides = [1, 1]} : vector<2x256xf32> to vector<2x64xf32>
    %78 = arith.negf %77 : vector<2x64xf32>
    %79 = math.exp %78 : vector<2x64xf32>
    %cst_20 = arith.constant 1.000000e+00 : f32
    %80 = vector.broadcast %cst_20 : f32 to vector<2x64xf32>
    %81 = arith.addf %80, %79 : vector<2x64xf32>
    %82 = arith.divf %80, %81 : vector<2x64xf32>
    %83 = vector.extract_strided_slice %76 {offsets = [0, 64], sizes = [2, 64], strides = [1, 1]} : vector<2x256xf32> to vector<2x64xf32>
    %84 = arith.negf %83 : vector<2x64xf32>
    %85 = math.exp %84 : vector<2x64xf32>
    %cst_21 = arith.constant 1.000000e+00 : f32
    %86 = vector.broadcast %cst_21 : f32 to vector<2x64xf32>
    %87 = arith.addf %86, %85 : vector<2x64xf32>
    %88 = arith.divf %86, %87 : vector<2x64xf32>
    %89 = vector.extract_strided_slice %76 {offsets = [0, 128], sizes = [2, 64], strides = [1, 1]} : vector<2x256xf32> to vector<2x64xf32>
    %90 = math.tanh %89 : vector<2x64xf32>
    %91 = vector.extract_strided_slice %76 {offsets = [0, 192], sizes = [2, 64], strides = [1, 1]} : vector<2x256xf32> to vector<2x64xf32>
    %92 = arith.negf %91 : vector<2x64xf32>
    %93 = math.exp %92 : vector<2x64xf32>
    %cst_22 = arith.constant 1.000000e+00 : f32
    %94 = vector.broadcast %cst_22 : f32 to vector<2x64xf32>
    %95 = arith.addf %94, %93 : vector<2x64xf32>
    %96 = arith.divf %94, %95 : vector<2x64xf32>
    %97 = arith.mulf %88, %39 : vector<2x64xf32>
    %98 = arith.mulf %82, %90 : vector<2x64xf32>
    %99 = arith.addf %97, %98 : vector<2x64xf32>
    %100 = math.tanh %99 : vector<2x64xf32>
    %101 = arith.mulf %96, %100 : vector<2x64xf32>
    %c1_i32 = arith.constant 1 : i32
    %102 = vector.broadcast %c1_i32 : i32 to vector<10x1xi32>
    %103 = arith.cmpi eq, %13, %102 : vector<10x1xi32>
    %104 = vector.extract_strided_slice %101 {offsets = [0, 0], sizes = [1, 32], strides = [1, 1]} : vector<2x64xf32> to vector<1x32xf32>
    %105 = vector.shape_cast %103 : vector<10x1xi1> to vector<10x1xi1>
    %106 = vector.broadcast %105 : vector<10x1xi1> to vector<10x32xi1>
    %107 = vector.shape_cast %104 : vector<1x32xf32> to vector<1x32xf32>
    %108 = vector.broadcast %107 : vector<1x32xf32> to vector<10x32xf32>
    %109 = arith.select %106, %108, %49 : vector<10x32xi1>, vector<10x32xf32>
    %c1_i32_23 = arith.constant 1 : i32
    %110 = vector.broadcast %c1_i32_23 : i32 to vector<10x1xi32>
    %111 = arith.cmpi eq, %13, %110 : vector<10x1xi32>
    %112 = vector.extract_strided_slice %101 {offsets = [1, 0], sizes = [1, 32], strides = [1, 1]} : vector<2x64xf32> to vector<1x32xf32>
    %113 = vector.shape_cast %111 : vector<10x1xi1> to vector<10x1xi1>
    %114 = vector.broadcast %113 : vector<10x1xi1> to vector<10x32xi1>
    %115 = vector.shape_cast %112 : vector<1x32xf32> to vector<1x32xf32>
    %116 = vector.broadcast %115 : vector<1x32xf32> to vector<10x32xf32>
    %117 = arith.select %114, %116, %57 : vector<10x32xi1>, vector<10x32xf32>
    %c8_i32 = arith.constant 8 : i32
    %118 = vector.broadcast %c8_i32 : i32 to vector<10x1xi32>
    %119 = arith.cmpi eq, %13, %118 : vector<10x1xi32>
    %120 = vector.extract_strided_slice %101 {offsets = [0, 32], sizes = [1, 32], strides = [1, 1]} : vector<2x64xf32> to vector<1x32xf32>
    %121 = vector.shape_cast %119 : vector<10x1xi1> to vector<10x1xi1>
    %122 = vector.broadcast %121 : vector<10x1xi1> to vector<10x32xi1>
    %123 = vector.shape_cast %120 : vector<1x32xf32> to vector<1x32xf32>
    %124 = vector.broadcast %123 : vector<1x32xf32> to vector<10x32xf32>
    %125 = arith.select %122, %124, %65 : vector<10x32xi1>, vector<10x32xf32>
    %c8_i32_24 = arith.constant 8 : i32
    %126 = vector.broadcast %c8_i32_24 : i32 to vector<10x1xi32>
    %127 = arith.cmpi eq, %13, %126 : vector<10x1xi32>
    %128 = vector.extract_strided_slice %101 {offsets = [1, 32], sizes = [1, 32], strides = [1, 1]} : vector<2x64xf32> to vector<1x32xf32>
    %129 = vector.shape_cast %127 : vector<10x1xi1> to vector<10x1xi1>
    %130 = vector.broadcast %129 : vector<10x1xi1> to vector<10x32xi1>
    %131 = vector.shape_cast %128 : vector<1x32xf32> to vector<1x32xf32>
    %132 = vector.broadcast %131 : vector<1x32xf32> to vector<10x32xf32>
    %133 = arith.select %130, %132, %73 : vector<10x32xi1>, vector<10x32xf32>
    %134 = vector.extract_strided_slice %6 {offsets = [4, 0], sizes = [2, 256], strides = [1, 1]} : vector<20x256xf32> to vector<2x256xf32>
    %cst_25 = arith.constant dense<0.000000e+00> : vector<2x256xf32>
    %135 = tpu.matmul %101, %0, %cst_25 {dimension_numbers = #tpu.dot_dimension_numbers<[1], [0], [0], [1], [0, 0, 1, 1], [], []>} : vector<2x64xf32>, vector<64x256xf32>, vector<2x256xf32> -> vector<2x256xf32>
    %136 = arith.addf %134, %135 : vector<2x256xf32>
    %137 = vector.extract_strided_slice %136 {offsets = [0, 0], sizes = [2, 64], strides = [1, 1]} : vector<2x256xf32> to vector<2x64xf32>
    %138 = arith.negf %137 : vector<2x64xf32>
    %139 = math.exp %138 : vector<2x64xf32>
    %cst_26 = arith.constant 1.000000e+00 : f32
    %140 = vector.broadcast %cst_26 : f32 to vector<2x64xf32>
    %141 = arith.addf %140, %139 : vector<2x64xf32>
    %142 = arith.divf %140, %141 : vector<2x64xf32>
    %143 = vector.extract_strided_slice %136 {offsets = [0, 64], sizes = [2, 64], strides = [1, 1]} : vector<2x256xf32> to vector<2x64xf32>
    %144 = arith.negf %143 : vector<2x64xf32>
    %145 = math.exp %144 : vector<2x64xf32>
    %cst_27 = arith.constant 1.000000e+00 : f32
    %146 = vector.broadcast %cst_27 : f32 to vector<2x64xf32>
    %147 = arith.addf %146, %145 : vector<2x64xf32>
    %148 = arith.divf %146, %147 : vector<2x64xf32>
    %149 = vector.extract_strided_slice %136 {offsets = [0, 128], sizes = [2, 64], strides = [1, 1]} : vector<2x256xf32> to vector<2x64xf32>
    %150 = math.tanh %149 : vector<2x64xf32>
    %151 = vector.extract_strided_slice %136 {offsets = [0, 192], sizes = [2, 64], strides = [1, 1]} : vector<2x256xf32> to vector<2x64xf32>
    %152 = arith.negf %151 : vector<2x64xf32>
    %153 = math.exp %152 : vector<2x64xf32>
    %cst_28 = arith.constant 1.000000e+00 : f32
    %154 = vector.broadcast %cst_28 : f32 to vector<2x64xf32>
    %155 = arith.addf %154, %153 : vector<2x64xf32>
    %156 = arith.divf %154, %155 : vector<2x64xf32>
    %157 = arith.mulf %148, %99 : vector<2x64xf32>
    %158 = arith.mulf %142, %150 : vector<2x64xf32>
    %159 = arith.addf %157, %158 : vector<2x64xf32>
    %160 = math.tanh %159 : vector<2x64xf32>
    %161 = arith.mulf %156, %160 : vector<2x64xf32>
    %c2_i32 = arith.constant 2 : i32
    %162 = vector.broadcast %c2_i32 : i32 to vector<10x1xi32>
    %163 = arith.cmpi eq, %13, %162 : vector<10x1xi32>
    %164 = vector.extract_strided_slice %161 {offsets = [0, 0], sizes = [1, 32], strides = [1, 1]} : vector<2x64xf32> to vector<1x32xf32>
    %165 = vector.shape_cast %163 : vector<10x1xi1> to vector<10x1xi1>
    %166 = vector.broadcast %165 : vector<10x1xi1> to vector<10x32xi1>
    %167 = vector.shape_cast %164 : vector<1x32xf32> to vector<1x32xf32>
    %168 = vector.broadcast %167 : vector<1x32xf32> to vector<10x32xf32>
    %169 = arith.select %166, %168, %109 : vector<10x32xi1>, vector<10x32xf32>
    %c2_i32_29 = arith.constant 2 : i32
    %170 = vector.broadcast %c2_i32_29 : i32 to vector<10x1xi32>
    %171 = arith.cmpi eq, %13, %170 : vector<10x1xi32>
    %172 = vector.extract_strided_slice %161 {offsets = [1, 0], sizes = [1, 32], strides = [1, 1]} : vector<2x64xf32> to vector<1x32xf32>
    %173 = vector.shape_cast %171 : vector<10x1xi1> to vector<10x1xi1>
    %174 = vector.broadcast %173 : vector<10x1xi1> to vector<10x32xi1>
    %175 = vector.shape_cast %172 : vector<1x32xf32> to vector<1x32xf32>
    %176 = vector.broadcast %175 : vector<1x32xf32> to vector<10x32xf32>
    %177 = arith.select %174, %176, %117 : vector<10x32xi1>, vector<10x32xf32>
    %c7_i32 = arith.constant 7 : i32
    %178 = vector.broadcast %c7_i32 : i32 to vector<10x1xi32>
    %179 = arith.cmpi eq, %13, %178 : vector<10x1xi32>
    %180 = vector.extract_strided_slice %161 {offsets = [0, 32], sizes = [1, 32], strides = [1, 1]} : vector<2x64xf32> to vector<1x32xf32>
    %181 = vector.shape_cast %179 : vector<10x1xi1> to vector<10x1xi1>
    %182 = vector.broadcast %181 : vector<10x1xi1> to vector<10x32xi1>
    %183 = vector.shape_cast %180 : vector<1x32xf32> to vector<1x32xf32>
    %184 = vector.broadcast %183 : vector<1x32xf32> to vector<10x32xf32>
    %185 = arith.select %182, %184, %125 : vector<10x32xi1>, vector<10x32xf32>
    %c7_i32_30 = arith.constant 7 : i32
    %186 = vector.broadcast %c7_i32_30 : i32 to vector<10x1xi32>
    %187 = arith.cmpi eq, %13, %186 : vector<10x1xi32>
    %188 = vector.extract_strided_slice %161 {offsets = [1, 32], sizes = [1, 32], strides = [1, 1]} : vector<2x64xf32> to vector<1x32xf32>
    %189 = vector.shape_cast %187 : vector<10x1xi1> to vector<10x1xi1>
    %190 = vector.broadcast %189 : vector<10x1xi1> to vector<10x32xi1>
    %191 = vector.shape_cast %188 : vector<1x32xf32> to vector<1x32xf32>
    %192 = vector.broadcast %191 : vector<1x32xf32> to vector<10x32xf32>
    %193 = arith.select %190, %192, %133 : vector<10x32xi1>, vector<10x32xf32>
    %194 = vector.extract_strided_slice %6 {offsets = [6, 0], sizes = [2, 256], strides = [1, 1]} : vector<20x256xf32> to vector<2x256xf32>
    %cst_31 = arith.constant dense<0.000000e+00> : vector<2x256xf32>
    %195 = tpu.matmul %161, %0, %cst_31 {dimension_numbers = #tpu.dot_dimension_numbers<[1], [0], [0], [1], [0, 0, 1, 1], [], []>} : vector<2x64xf32>, vector<64x256xf32>, vector<2x256xf32> -> vector<2x256xf32>
    %196 = arith.addf %194, %195 : vector<2x256xf32>
    %197 = vector.extract_strided_slice %196 {offsets = [0, 0], sizes = [2, 64], strides = [1, 1]} : vector<2x256xf32> to vector<2x64xf32>
    %198 = arith.negf %197 : vector<2x64xf32>
    %199 = math.exp %198 : vector<2x64xf32>
    %cst_32 = arith.constant 1.000000e+00 : f32
    %200 = vector.broadcast %cst_32 : f32 to vector<2x64xf32>
    %201 = arith.addf %200, %199 : vector<2x64xf32>
    %202 = arith.divf %200, %201 : vector<2x64xf32>
    %203 = vector.extract_strided_slice %196 {offsets = [0, 64], sizes = [2, 64], strides = [1, 1]} : vector<2x256xf32> to vector<2x64xf32>
    %204 = arith.negf %203 : vector<2x64xf32>
    %205 = math.exp %204 : vector<2x64xf32>
    %cst_33 = arith.constant 1.000000e+00 : f32
    %206 = vector.broadcast %cst_33 : f32 to vector<2x64xf32>
    %207 = arith.addf %206, %205 : vector<2x64xf32>
    %208 = arith.divf %206, %207 : vector<2x64xf32>
    %209 = vector.extract_strided_slice %196 {offsets = [0, 128], sizes = [2, 64], strides = [1, 1]} : vector<2x256xf32> to vector<2x64xf32>
    %210 = math.tanh %209 : vector<2x64xf32>
    %211 = vector.extract_strided_slice %196 {offsets = [0, 192], sizes = [2, 64], strides = [1, 1]} : vector<2x256xf32> to vector<2x64xf32>
    %212 = arith.negf %211 : vector<2x64xf32>
    %213 = math.exp %212 : vector<2x64xf32>
    %cst_34 = arith.constant 1.000000e+00 : f32
    %214 = vector.broadcast %cst_34 : f32 to vector<2x64xf32>
    %215 = arith.addf %214, %213 : vector<2x64xf32>
    %216 = arith.divf %214, %215 : vector<2x64xf32>
    %217 = arith.mulf %208, %159 : vector<2x64xf32>
    %218 = arith.mulf %202, %210 : vector<2x64xf32>
    %219 = arith.addf %217, %218 : vector<2x64xf32>
    %220 = math.tanh %219 : vector<2x64xf32>
    %221 = arith.mulf %216, %220 : vector<2x64xf32>
    %c3_i32 = arith.constant 3 : i32
    %222 = vector.broadcast %c3_i32 : i32 to vector<10x1xi32>
    %223 = arith.cmpi eq, %13, %222 : vector<10x1xi32>
    %224 = vector.extract_strided_slice %221 {offsets = [0, 0], sizes = [1, 32], strides = [1, 1]} : vector<2x64xf32> to vector<1x32xf32>
    %225 = vector.shape_cast %223 : vector<10x1xi1> to vector<10x1xi1>
    %226 = vector.broadcast %225 : vector<10x1xi1> to vector<10x32xi1>
    %227 = vector.shape_cast %224 : vector<1x32xf32> to vector<1x32xf32>
    %228 = vector.broadcast %227 : vector<1x32xf32> to vector<10x32xf32>
    %229 = arith.select %226, %228, %169 : vector<10x32xi1>, vector<10x32xf32>
    %c3_i32_35 = arith.constant 3 : i32
    %230 = vector.broadcast %c3_i32_35 : i32 to vector<10x1xi32>
    %231 = arith.cmpi eq, %13, %230 : vector<10x1xi32>
    %232 = vector.extract_strided_slice %221 {offsets = [1, 0], sizes = [1, 32], strides = [1, 1]} : vector<2x64xf32> to vector<1x32xf32>
    %233 = vector.shape_cast %231 : vector<10x1xi1> to vector<10x1xi1>
    %234 = vector.broadcast %233 : vector<10x1xi1> to vector<10x32xi1>
    %235 = vector.shape_cast %232 : vector<1x32xf32> to vector<1x32xf32>
    %236 = vector.broadcast %235 : vector<1x32xf32> to vector<10x32xf32>
    %237 = arith.select %234, %236, %177 : vector<10x32xi1>, vector<10x32xf32>
    %c6_i32 = arith.constant 6 : i32
    %238 = vector.broadcast %c6_i32 : i32 to vector<10x1xi32>
    %239 = arith.cmpi eq, %13, %238 : vector<10x1xi32>
    %240 = vector.extract_strided_slice %221 {offsets = [0, 32], sizes = [1, 32], strides = [1, 1]} : vector<2x64xf32> to vector<1x32xf32>
    %241 = vector.shape_cast %239 : vector<10x1xi1> to vector<10x1xi1>
    %242 = vector.broadcast %241 : vector<10x1xi1> to vector<10x32xi1>
    %243 = vector.shape_cast %240 : vector<1x32xf32> to vector<1x32xf32>
    %244 = vector.broadcast %243 : vector<1x32xf32> to vector<10x32xf32>
    %245 = arith.select %242, %244, %185 : vector<10x32xi1>, vector<10x32xf32>
    %c6_i32_36 = arith.constant 6 : i32
    %246 = vector.broadcast %c6_i32_36 : i32 to vector<10x1xi32>
    %247 = arith.cmpi eq, %13, %246 : vector<10x1xi32>
    %248 = vector.extract_strided_slice %221 {offsets = [1, 32], sizes = [1, 32], strides = [1, 1]} : vector<2x64xf32> to vector<1x32xf32>
    %249 = vector.shape_cast %247 : vector<10x1xi1> to vector<10x1xi1>
    %250 = vector.broadcast %249 : vector<10x1xi1> to vector<10x32xi1>
    %251 = vector.shape_cast %248 : vector<1x32xf32> to vector<1x32xf32>
    %252 = vector.broadcast %251 : vector<1x32xf32> to vector<10x32xf32>
    %253 = arith.select %250, %252, %193 : vector<10x32xi1>, vector<10x32xf32>
    %254 = vector.extract_strided_slice %6 {offsets = [8, 0], sizes = [2, 256], strides = [1, 1]} : vector<20x256xf32> to vector<2x256xf32>
    %cst_37 = arith.constant dense<0.000000e+00> : vector<2x256xf32>
    %255 = tpu.matmul %221, %0, %cst_37 {dimension_numbers = #tpu.dot_dimension_numbers<[1], [0], [0], [1], [0, 0, 1, 1], [], []>} : vector<2x64xf32>, vector<64x256xf32>, vector<2x256xf32> -> vector<2x256xf32>
    %256 = arith.addf %254, %255 : vector<2x256xf32>
    %257 = vector.extract_strided_slice %256 {offsets = [0, 0], sizes = [2, 64], strides = [1, 1]} : vector<2x256xf32> to vector<2x64xf32>
    %258 = arith.negf %257 : vector<2x64xf32>
    %259 = math.exp %258 : vector<2x64xf32>
    %cst_38 = arith.constant 1.000000e+00 : f32
    %260 = vector.broadcast %cst_38 : f32 to vector<2x64xf32>
    %261 = arith.addf %260, %259 : vector<2x64xf32>
    %262 = arith.divf %260, %261 : vector<2x64xf32>
    %263 = vector.extract_strided_slice %256 {offsets = [0, 64], sizes = [2, 64], strides = [1, 1]} : vector<2x256xf32> to vector<2x64xf32>
    %264 = arith.negf %263 : vector<2x64xf32>
    %265 = math.exp %264 : vector<2x64xf32>
    %cst_39 = arith.constant 1.000000e+00 : f32
    %266 = vector.broadcast %cst_39 : f32 to vector<2x64xf32>
    %267 = arith.addf %266, %265 : vector<2x64xf32>
    %268 = arith.divf %266, %267 : vector<2x64xf32>
    %269 = vector.extract_strided_slice %256 {offsets = [0, 128], sizes = [2, 64], strides = [1, 1]} : vector<2x256xf32> to vector<2x64xf32>
    %270 = math.tanh %269 : vector<2x64xf32>
    %271 = vector.extract_strided_slice %256 {offsets = [0, 192], sizes = [2, 64], strides = [1, 1]} : vector<2x256xf32> to vector<2x64xf32>
    %272 = arith.negf %271 : vector<2x64xf32>
    %273 = math.exp %272 : vector<2x64xf32>
    %cst_40 = arith.constant 1.000000e+00 : f32
    %274 = vector.broadcast %cst_40 : f32 to vector<2x64xf32>
    %275 = arith.addf %274, %273 : vector<2x64xf32>
    %276 = arith.divf %274, %275 : vector<2x64xf32>
    %277 = arith.mulf %268, %219 : vector<2x64xf32>
    %278 = arith.mulf %262, %270 : vector<2x64xf32>
    %279 = arith.addf %277, %278 : vector<2x64xf32>
    %280 = math.tanh %279 : vector<2x64xf32>
    %281 = arith.mulf %276, %280 : vector<2x64xf32>
    %c4_i32 = arith.constant 4 : i32
    %282 = vector.broadcast %c4_i32 : i32 to vector<10x1xi32>
    %283 = arith.cmpi eq, %13, %282 : vector<10x1xi32>
    %284 = vector.extract_strided_slice %281 {offsets = [0, 0], sizes = [1, 32], strides = [1, 1]} : vector<2x64xf32> to vector<1x32xf32>
    %285 = vector.shape_cast %283 : vector<10x1xi1> to vector<10x1xi1>
    %286 = vector.broadcast %285 : vector<10x1xi1> to vector<10x32xi1>
    %287 = vector.shape_cast %284 : vector<1x32xf32> to vector<1x32xf32>
    %288 = vector.broadcast %287 : vector<1x32xf32> to vector<10x32xf32>
    %289 = arith.select %286, %288, %229 : vector<10x32xi1>, vector<10x32xf32>
    %c4_i32_41 = arith.constant 4 : i32
    %290 = vector.broadcast %c4_i32_41 : i32 to vector<10x1xi32>
    %291 = arith.cmpi eq, %13, %290 : vector<10x1xi32>
    %292 = vector.extract_strided_slice %281 {offsets = [1, 0], sizes = [1, 32], strides = [1, 1]} : vector<2x64xf32> to vector<1x32xf32>
    %293 = vector.shape_cast %291 : vector<10x1xi1> to vector<10x1xi1>
    %294 = vector.broadcast %293 : vector<10x1xi1> to vector<10x32xi1>
    %295 = vector.shape_cast %292 : vector<1x32xf32> to vector<1x32xf32>
    %296 = vector.broadcast %295 : vector<1x32xf32> to vector<10x32xf32>
    %297 = arith.select %294, %296, %237 : vector<10x32xi1>, vector<10x32xf32>
    %c5_i32 = arith.constant 5 : i32
    %298 = vector.broadcast %c5_i32 : i32 to vector<10x1xi32>
    %299 = arith.cmpi eq, %13, %298 : vector<10x1xi32>
    %300 = vector.extract_strided_slice %281 {offsets = [0, 32], sizes = [1, 32], strides = [1, 1]} : vector<2x64xf32> to vector<1x32xf32>
    %301 = vector.shape_cast %299 : vector<10x1xi1> to vector<10x1xi1>
    %302 = vector.broadcast %301 : vector<10x1xi1> to vector<10x32xi1>
    %303 = vector.shape_cast %300 : vector<1x32xf32> to vector<1x32xf32>
    %304 = vector.broadcast %303 : vector<1x32xf32> to vector<10x32xf32>
    %305 = arith.select %302, %304, %245 : vector<10x32xi1>, vector<10x32xf32>
    %c5_i32_42 = arith.constant 5 : i32
    %306 = vector.broadcast %c5_i32_42 : i32 to vector<10x1xi32>
    %307 = arith.cmpi eq, %13, %306 : vector<10x1xi32>
    %308 = vector.extract_strided_slice %281 {offsets = [1, 32], sizes = [1, 32], strides = [1, 1]} : vector<2x64xf32> to vector<1x32xf32>
    %309 = vector.shape_cast %307 : vector<10x1xi1> to vector<10x1xi1>
    %310 = vector.broadcast %309 : vector<10x1xi1> to vector<10x32xi1>
    %311 = vector.shape_cast %308 : vector<1x32xf32> to vector<1x32xf32>
    %312 = vector.broadcast %311 : vector<1x32xf32> to vector<10x32xf32>
    %313 = arith.select %310, %312, %253 : vector<10x32xi1>, vector<10x32xf32>
    %314 = vector.extract_strided_slice %6 {offsets = [10, 0], sizes = [2, 256], strides = [1, 1]} : vector<20x256xf32> to vector<2x256xf32>
    %cst_43 = arith.constant dense<0.000000e+00> : vector<2x256xf32>
    %315 = tpu.matmul %281, %0, %cst_43 {dimension_numbers = #tpu.dot_dimension_numbers<[1], [0], [0], [1], [0, 0, 1, 1], [], []>} : vector<2x64xf32>, vector<64x256xf32>, vector<2x256xf32> -> vector<2x256xf32>
    %316 = arith.addf %314, %315 : vector<2x256xf32>
    %317 = vector.extract_strided_slice %316 {offsets = [0, 0], sizes = [2, 64], strides = [1, 1]} : vector<2x256xf32> to vector<2x64xf32>
    %318 = arith.negf %317 : vector<2x64xf32>
    %319 = math.exp %318 : vector<2x64xf32>
    %cst_44 = arith.constant 1.000000e+00 : f32
    %320 = vector.broadcast %cst_44 : f32 to vector<2x64xf32>
    %321 = arith.addf %320, %319 : vector<2x64xf32>
    %322 = arith.divf %320, %321 : vector<2x64xf32>
    %323 = vector.extract_strided_slice %316 {offsets = [0, 64], sizes = [2, 64], strides = [1, 1]} : vector<2x256xf32> to vector<2x64xf32>
    %324 = arith.negf %323 : vector<2x64xf32>
    %325 = math.exp %324 : vector<2x64xf32>
    %cst_45 = arith.constant 1.000000e+00 : f32
    %326 = vector.broadcast %cst_45 : f32 to vector<2x64xf32>
    %327 = arith.addf %326, %325 : vector<2x64xf32>
    %328 = arith.divf %326, %327 : vector<2x64xf32>
    %329 = vector.extract_strided_slice %316 {offsets = [0, 128], sizes = [2, 64], strides = [1, 1]} : vector<2x256xf32> to vector<2x64xf32>
    %330 = math.tanh %329 : vector<2x64xf32>
    %331 = vector.extract_strided_slice %316 {offsets = [0, 192], sizes = [2, 64], strides = [1, 1]} : vector<2x256xf32> to vector<2x64xf32>
    %332 = arith.negf %331 : vector<2x64xf32>
    %333 = math.exp %332 : vector<2x64xf32>
    %cst_46 = arith.constant 1.000000e+00 : f32
    %334 = vector.broadcast %cst_46 : f32 to vector<2x64xf32>
    %335 = arith.addf %334, %333 : vector<2x64xf32>
    %336 = arith.divf %334, %335 : vector<2x64xf32>
    %337 = arith.mulf %328, %279 : vector<2x64xf32>
    %338 = arith.mulf %322, %330 : vector<2x64xf32>
    %339 = arith.addf %337, %338 : vector<2x64xf32>
    %340 = math.tanh %339 : vector<2x64xf32>
    %341 = arith.mulf %336, %340 : vector<2x64xf32>
    %c5_i32_47 = arith.constant 5 : i32
    %342 = vector.broadcast %c5_i32_47 : i32 to vector<10x1xi32>
    %343 = arith.cmpi eq, %13, %342 : vector<10x1xi32>
    %344 = vector.extract_strided_slice %341 {offsets = [0, 0], sizes = [1, 32], strides = [1, 1]} : vector<2x64xf32> to vector<1x32xf32>
    %345 = vector.shape_cast %343 : vector<10x1xi1> to vector<10x1xi1>
    %346 = vector.broadcast %345 : vector<10x1xi1> to vector<10x32xi1>
    %347 = vector.shape_cast %344 : vector<1x32xf32> to vector<1x32xf32>
    %348 = vector.broadcast %347 : vector<1x32xf32> to vector<10x32xf32>
    %349 = arith.select %346, %348, %289 : vector<10x32xi1>, vector<10x32xf32>
    %c5_i32_48 = arith.constant 5 : i32
    %350 = vector.broadcast %c5_i32_48 : i32 to vector<10x1xi32>
    %351 = arith.cmpi eq, %13, %350 : vector<10x1xi32>
    %352 = vector.extract_strided_slice %341 {offsets = [1, 0], sizes = [1, 32], strides = [1, 1]} : vector<2x64xf32> to vector<1x32xf32>
    %353 = vector.shape_cast %351 : vector<10x1xi1> to vector<10x1xi1>
    %354 = vector.broadcast %353 : vector<10x1xi1> to vector<10x32xi1>
    %355 = vector.shape_cast %352 : vector<1x32xf32> to vector<1x32xf32>
    %356 = vector.broadcast %355 : vector<1x32xf32> to vector<10x32xf32>
    %357 = arith.select %354, %356, %297 : vector<10x32xi1>, vector<10x32xf32>
    %c4_i32_49 = arith.constant 4 : i32
    %358 = vector.broadcast %c4_i32_49 : i32 to vector<10x1xi32>
    %359 = arith.cmpi eq, %13, %358 : vector<10x1xi32>
    %360 = vector.extract_strided_slice %341 {offsets = [0, 32], sizes = [1, 32], strides = [1, 1]} : vector<2x64xf32> to vector<1x32xf32>
    %361 = vector.shape_cast %359 : vector<10x1xi1> to vector<10x1xi1>
    %362 = vector.broadcast %361 : vector<10x1xi1> to vector<10x32xi1>
    %363 = vector.shape_cast %360 : vector<1x32xf32> to vector<1x32xf32>
    %364 = vector.broadcast %363 : vector<1x32xf32> to vector<10x32xf32>
    %365 = arith.select %362, %364, %305 : vector<10x32xi1>, vector<10x32xf32>
    %c4_i32_50 = arith.constant 4 : i32
    %366 = vector.broadcast %c4_i32_50 : i32 to vector<10x1xi32>
    %367 = arith.cmpi eq, %13, %366 : vector<10x1xi32>
    %368 = vector.extract_strided_slice %341 {offsets = [1, 32], sizes = [1, 32], strides = [1, 1]} : vector<2x64xf32> to vector<1x32xf32>
    %369 = vector.shape_cast %367 : vector<10x1xi1> to vector<10x1xi1>
    %370 = vector.broadcast %369 : vector<10x1xi1> to vector<10x32xi1>
    %371 = vector.shape_cast %368 : vector<1x32xf32> to vector<1x32xf32>
    %372 = vector.broadcast %371 : vector<1x32xf32> to vector<10x32xf32>
    %373 = arith.select %370, %372, %313 : vector<10x32xi1>, vector<10x32xf32>
    %374 = vector.extract_strided_slice %6 {offsets = [12, 0], sizes = [2, 256], strides = [1, 1]} : vector<20x256xf32> to vector<2x256xf32>
    %cst_51 = arith.constant dense<0.000000e+00> : vector<2x256xf32>
    %375 = tpu.matmul %341, %0, %cst_51 {dimension_numbers = #tpu.dot_dimension_numbers<[1], [0], [0], [1], [0, 0, 1, 1], [], []>} : vector<2x64xf32>, vector<64x256xf32>, vector<2x256xf32> -> vector<2x256xf32>
    %376 = arith.addf %374, %375 : vector<2x256xf32>
    %377 = vector.extract_strided_slice %376 {offsets = [0, 0], sizes = [2, 64], strides = [1, 1]} : vector<2x256xf32> to vector<2x64xf32>
    %378 = arith.negf %377 : vector<2x64xf32>
    %379 = math.exp %378 : vector<2x64xf32>
    %cst_52 = arith.constant 1.000000e+00 : f32
    %380 = vector.broadcast %cst_52 : f32 to vector<2x64xf32>
    %381 = arith.addf %380, %379 : vector<2x64xf32>
    %382 = arith.divf %380, %381 : vector<2x64xf32>
    %383 = vector.extract_strided_slice %376 {offsets = [0, 64], sizes = [2, 64], strides = [1, 1]} : vector<2x256xf32> to vector<2x64xf32>
    %384 = arith.negf %383 : vector<2x64xf32>
    %385 = math.exp %384 : vector<2x64xf32>
    %cst_53 = arith.constant 1.000000e+00 : f32
    %386 = vector.broadcast %cst_53 : f32 to vector<2x64xf32>
    %387 = arith.addf %386, %385 : vector<2x64xf32>
    %388 = arith.divf %386, %387 : vector<2x64xf32>
    %389 = vector.extract_strided_slice %376 {offsets = [0, 128], sizes = [2, 64], strides = [1, 1]} : vector<2x256xf32> to vector<2x64xf32>
    %390 = math.tanh %389 : vector<2x64xf32>
    %391 = vector.extract_strided_slice %376 {offsets = [0, 192], sizes = [2, 64], strides = [1, 1]} : vector<2x256xf32> to vector<2x64xf32>
    %392 = arith.negf %391 : vector<2x64xf32>
    %393 = math.exp %392 : vector<2x64xf32>
    %cst_54 = arith.constant 1.000000e+00 : f32
    %394 = vector.broadcast %cst_54 : f32 to vector<2x64xf32>
    %395 = arith.addf %394, %393 : vector<2x64xf32>
    %396 = arith.divf %394, %395 : vector<2x64xf32>
    %397 = arith.mulf %388, %339 : vector<2x64xf32>
    %398 = arith.mulf %382, %390 : vector<2x64xf32>
    %399 = arith.addf %397, %398 : vector<2x64xf32>
    %400 = math.tanh %399 : vector<2x64xf32>
    %401 = arith.mulf %396, %400 : vector<2x64xf32>
    %c6_i32_55 = arith.constant 6 : i32
    %402 = vector.broadcast %c6_i32_55 : i32 to vector<10x1xi32>
    %403 = arith.cmpi eq, %13, %402 : vector<10x1xi32>
    %404 = vector.extract_strided_slice %401 {offsets = [0, 0], sizes = [1, 32], strides = [1, 1]} : vector<2x64xf32> to vector<1x32xf32>
    %405 = vector.shape_cast %403 : vector<10x1xi1> to vector<10x1xi1>
    %406 = vector.broadcast %405 : vector<10x1xi1> to vector<10x32xi1>
    %407 = vector.shape_cast %404 : vector<1x32xf32> to vector<1x32xf32>
    %408 = vector.broadcast %407 : vector<1x32xf32> to vector<10x32xf32>
    %409 = arith.select %406, %408, %349 : vector<10x32xi1>, vector<10x32xf32>
    %c6_i32_56 = arith.constant 6 : i32
    %410 = vector.broadcast %c6_i32_56 : i32 to vector<10x1xi32>
    %411 = arith.cmpi eq, %13, %410 : vector<10x1xi32>
    %412 = vector.extract_strided_slice %401 {offsets = [1, 0], sizes = [1, 32], strides = [1, 1]} : vector<2x64xf32> to vector<1x32xf32>
    %413 = vector.shape_cast %411 : vector<10x1xi1> to vector<10x1xi1>
    %414 = vector.broadcast %413 : vector<10x1xi1> to vector<10x32xi1>
    %415 = vector.shape_cast %412 : vector<1x32xf32> to vector<1x32xf32>
    %416 = vector.broadcast %415 : vector<1x32xf32> to vector<10x32xf32>
    %417 = arith.select %414, %416, %357 : vector<10x32xi1>, vector<10x32xf32>
    %c3_i32_57 = arith.constant 3 : i32
    %418 = vector.broadcast %c3_i32_57 : i32 to vector<10x1xi32>
    %419 = arith.cmpi eq, %13, %418 : vector<10x1xi32>
    %420 = vector.extract_strided_slice %401 {offsets = [0, 32], sizes = [1, 32], strides = [1, 1]} : vector<2x64xf32> to vector<1x32xf32>
    %421 = vector.shape_cast %419 : vector<10x1xi1> to vector<10x1xi1>
    %422 = vector.broadcast %421 : vector<10x1xi1> to vector<10x32xi1>
    %423 = vector.shape_cast %420 : vector<1x32xf32> to vector<1x32xf32>
    %424 = vector.broadcast %423 : vector<1x32xf32> to vector<10x32xf32>
    %425 = arith.select %422, %424, %365 : vector<10x32xi1>, vector<10x32xf32>
    %c3_i32_58 = arith.constant 3 : i32
    %426 = vector.broadcast %c3_i32_58 : i32 to vector<10x1xi32>
    %427 = arith.cmpi eq, %13, %426 : vector<10x1xi32>
    %428 = vector.extract_strided_slice %401 {offsets = [1, 32], sizes = [1, 32], strides = [1, 1]} : vector<2x64xf32> to vector<1x32xf32>
    %429 = vector.shape_cast %427 : vector<10x1xi1> to vector<10x1xi1>
    %430 = vector.broadcast %429 : vector<10x1xi1> to vector<10x32xi1>
    %431 = vector.shape_cast %428 : vector<1x32xf32> to vector<1x32xf32>
    %432 = vector.broadcast %431 : vector<1x32xf32> to vector<10x32xf32>
    %433 = arith.select %430, %432, %373 : vector<10x32xi1>, vector<10x32xf32>
    %434 = vector.extract_strided_slice %6 {offsets = [14, 0], sizes = [2, 256], strides = [1, 1]} : vector<20x256xf32> to vector<2x256xf32>
    %cst_59 = arith.constant dense<0.000000e+00> : vector<2x256xf32>
    %435 = tpu.matmul %401, %0, %cst_59 {dimension_numbers = #tpu.dot_dimension_numbers<[1], [0], [0], [1], [0, 0, 1, 1], [], []>} : vector<2x64xf32>, vector<64x256xf32>, vector<2x256xf32> -> vector<2x256xf32>
    %436 = arith.addf %434, %435 : vector<2x256xf32>
    %437 = vector.extract_strided_slice %436 {offsets = [0, 0], sizes = [2, 64], strides = [1, 1]} : vector<2x256xf32> to vector<2x64xf32>
    %438 = arith.negf %437 : vector<2x64xf32>
    %439 = math.exp %438 : vector<2x64xf32>
    %cst_60 = arith.constant 1.000000e+00 : f32
    %440 = vector.broadcast %cst_60 : f32 to vector<2x64xf32>
    %441 = arith.addf %440, %439 : vector<2x64xf32>
    %442 = arith.divf %440, %441 : vector<2x64xf32>
    %443 = vector.extract_strided_slice %436 {offsets = [0, 64], sizes = [2, 64], strides = [1, 1]} : vector<2x256xf32> to vector<2x64xf32>
    %444 = arith.negf %443 : vector<2x64xf32>
    %445 = math.exp %444 : vector<2x64xf32>
    %cst_61 = arith.constant 1.000000e+00 : f32
    %446 = vector.broadcast %cst_61 : f32 to vector<2x64xf32>
    %447 = arith.addf %446, %445 : vector<2x64xf32>
    %448 = arith.divf %446, %447 : vector<2x64xf32>
    %449 = vector.extract_strided_slice %436 {offsets = [0, 128], sizes = [2, 64], strides = [1, 1]} : vector<2x256xf32> to vector<2x64xf32>
    %450 = math.tanh %449 : vector<2x64xf32>
    %451 = vector.extract_strided_slice %436 {offsets = [0, 192], sizes = [2, 64], strides = [1, 1]} : vector<2x256xf32> to vector<2x64xf32>
    %452 = arith.negf %451 : vector<2x64xf32>
    %453 = math.exp %452 : vector<2x64xf32>
    %cst_62 = arith.constant 1.000000e+00 : f32
    %454 = vector.broadcast %cst_62 : f32 to vector<2x64xf32>
    %455 = arith.addf %454, %453 : vector<2x64xf32>
    %456 = arith.divf %454, %455 : vector<2x64xf32>
    %457 = arith.mulf %448, %399 : vector<2x64xf32>
    %458 = arith.mulf %442, %450 : vector<2x64xf32>
    %459 = arith.addf %457, %458 : vector<2x64xf32>
    %460 = math.tanh %459 : vector<2x64xf32>
    %461 = arith.mulf %456, %460 : vector<2x64xf32>
    %c7_i32_63 = arith.constant 7 : i32
    %462 = vector.broadcast %c7_i32_63 : i32 to vector<10x1xi32>
    %463 = arith.cmpi eq, %13, %462 : vector<10x1xi32>
    %464 = vector.extract_strided_slice %461 {offsets = [0, 0], sizes = [1, 32], strides = [1, 1]} : vector<2x64xf32> to vector<1x32xf32>
    %465 = vector.shape_cast %463 : vector<10x1xi1> to vector<10x1xi1>
    %466 = vector.broadcast %465 : vector<10x1xi1> to vector<10x32xi1>
    %467 = vector.shape_cast %464 : vector<1x32xf32> to vector<1x32xf32>
    %468 = vector.broadcast %467 : vector<1x32xf32> to vector<10x32xf32>
    %469 = arith.select %466, %468, %409 : vector<10x32xi1>, vector<10x32xf32>
    %c7_i32_64 = arith.constant 7 : i32
    %470 = vector.broadcast %c7_i32_64 : i32 to vector<10x1xi32>
    %471 = arith.cmpi eq, %13, %470 : vector<10x1xi32>
    %472 = vector.extract_strided_slice %461 {offsets = [1, 0], sizes = [1, 32], strides = [1, 1]} : vector<2x64xf32> to vector<1x32xf32>
    %473 = vector.shape_cast %471 : vector<10x1xi1> to vector<10x1xi1>
    %474 = vector.broadcast %473 : vector<10x1xi1> to vector<10x32xi1>
    %475 = vector.shape_cast %472 : vector<1x32xf32> to vector<1x32xf32>
    %476 = vector.broadcast %475 : vector<1x32xf32> to vector<10x32xf32>
    %477 = arith.select %474, %476, %417 : vector<10x32xi1>, vector<10x32xf32>
    %c2_i32_65 = arith.constant 2 : i32
    %478 = vector.broadcast %c2_i32_65 : i32 to vector<10x1xi32>
    %479 = arith.cmpi eq, %13, %478 : vector<10x1xi32>
    %480 = vector.extract_strided_slice %461 {offsets = [0, 32], sizes = [1, 32], strides = [1, 1]} : vector<2x64xf32> to vector<1x32xf32>
    %481 = vector.shape_cast %479 : vector<10x1xi1> to vector<10x1xi1>
    %482 = vector.broadcast %481 : vector<10x1xi1> to vector<10x32xi1>
    %483 = vector.shape_cast %480 : vector<1x32xf32> to vector<1x32xf32>
    %484 = vector.broadcast %483 : vector<1x32xf32> to vector<10x32xf32>
    %485 = arith.select %482, %484, %425 : vector<10x32xi1>, vector<10x32xf32>
    %c2_i32_66 = arith.constant 2 : i32
    %486 = vector.broadcast %c2_i32_66 : i32 to vector<10x1xi32>
    %487 = arith.cmpi eq, %13, %486 : vector<10x1xi32>
    %488 = vector.extract_strided_slice %461 {offsets = [1, 32], sizes = [1, 32], strides = [1, 1]} : vector<2x64xf32> to vector<1x32xf32>
    %489 = vector.shape_cast %487 : vector<10x1xi1> to vector<10x1xi1>
    %490 = vector.broadcast %489 : vector<10x1xi1> to vector<10x32xi1>
    %491 = vector.shape_cast %488 : vector<1x32xf32> to vector<1x32xf32>
    %492 = vector.broadcast %491 : vector<1x32xf32> to vector<10x32xf32>
    %493 = arith.select %490, %492, %433 : vector<10x32xi1>, vector<10x32xf32>
    %494 = vector.extract_strided_slice %6 {offsets = [16, 0], sizes = [2, 256], strides = [1, 1]} : vector<20x256xf32> to vector<2x256xf32>
    %cst_67 = arith.constant dense<0.000000e+00> : vector<2x256xf32>
    %495 = tpu.matmul %461, %0, %cst_67 {dimension_numbers = #tpu.dot_dimension_numbers<[1], [0], [0], [1], [0, 0, 1, 1], [], []>} : vector<2x64xf32>, vector<64x256xf32>, vector<2x256xf32> -> vector<2x256xf32>
    %496 = arith.addf %494, %495 : vector<2x256xf32>
    %497 = vector.extract_strided_slice %496 {offsets = [0, 0], sizes = [2, 64], strides = [1, 1]} : vector<2x256xf32> to vector<2x64xf32>
    %498 = arith.negf %497 : vector<2x64xf32>
    %499 = math.exp %498 : vector<2x64xf32>
    %cst_68 = arith.constant 1.000000e+00 : f32
    %500 = vector.broadcast %cst_68 : f32 to vector<2x64xf32>
    %501 = arith.addf %500, %499 : vector<2x64xf32>
    %502 = arith.divf %500, %501 : vector<2x64xf32>
    %503 = vector.extract_strided_slice %496 {offsets = [0, 64], sizes = [2, 64], strides = [1, 1]} : vector<2x256xf32> to vector<2x64xf32>
    %504 = arith.negf %503 : vector<2x64xf32>
    %505 = math.exp %504 : vector<2x64xf32>
    %cst_69 = arith.constant 1.000000e+00 : f32
    %506 = vector.broadcast %cst_69 : f32 to vector<2x64xf32>
    %507 = arith.addf %506, %505 : vector<2x64xf32>
    %508 = arith.divf %506, %507 : vector<2x64xf32>
    %509 = vector.extract_strided_slice %496 {offsets = [0, 128], sizes = [2, 64], strides = [1, 1]} : vector<2x256xf32> to vector<2x64xf32>
    %510 = math.tanh %509 : vector<2x64xf32>
    %511 = vector.extract_strided_slice %496 {offsets = [0, 192], sizes = [2, 64], strides = [1, 1]} : vector<2x256xf32> to vector<2x64xf32>
    %512 = arith.negf %511 : vector<2x64xf32>
    %513 = math.exp %512 : vector<2x64xf32>
    %cst_70 = arith.constant 1.000000e+00 : f32
    %514 = vector.broadcast %cst_70 : f32 to vector<2x64xf32>
    %515 = arith.addf %514, %513 : vector<2x64xf32>
    %516 = arith.divf %514, %515 : vector<2x64xf32>
    %517 = arith.mulf %508, %459 : vector<2x64xf32>
    %518 = arith.mulf %502, %510 : vector<2x64xf32>
    %519 = arith.addf %517, %518 : vector<2x64xf32>
    %520 = math.tanh %519 : vector<2x64xf32>
    %521 = arith.mulf %516, %520 : vector<2x64xf32>
    %c8_i32_71 = arith.constant 8 : i32
    %522 = vector.broadcast %c8_i32_71 : i32 to vector<10x1xi32>
    %523 = arith.cmpi eq, %13, %522 : vector<10x1xi32>
    %524 = vector.extract_strided_slice %521 {offsets = [0, 0], sizes = [1, 32], strides = [1, 1]} : vector<2x64xf32> to vector<1x32xf32>
    %525 = vector.shape_cast %523 : vector<10x1xi1> to vector<10x1xi1>
    %526 = vector.broadcast %525 : vector<10x1xi1> to vector<10x32xi1>
    %527 = vector.shape_cast %524 : vector<1x32xf32> to vector<1x32xf32>
    %528 = vector.broadcast %527 : vector<1x32xf32> to vector<10x32xf32>
    %529 = arith.select %526, %528, %469 : vector<10x32xi1>, vector<10x32xf32>
    %c8_i32_72 = arith.constant 8 : i32
    %530 = vector.broadcast %c8_i32_72 : i32 to vector<10x1xi32>
    %531 = arith.cmpi eq, %13, %530 : vector<10x1xi32>
    %532 = vector.extract_strided_slice %521 {offsets = [1, 0], sizes = [1, 32], strides = [1, 1]} : vector<2x64xf32> to vector<1x32xf32>
    %533 = vector.shape_cast %531 : vector<10x1xi1> to vector<10x1xi1>
    %534 = vector.broadcast %533 : vector<10x1xi1> to vector<10x32xi1>
    %535 = vector.shape_cast %532 : vector<1x32xf32> to vector<1x32xf32>
    %536 = vector.broadcast %535 : vector<1x32xf32> to vector<10x32xf32>
    %537 = arith.select %534, %536, %477 : vector<10x32xi1>, vector<10x32xf32>
    %c1_i32_73 = arith.constant 1 : i32
    %538 = vector.broadcast %c1_i32_73 : i32 to vector<10x1xi32>
    %539 = arith.cmpi eq, %13, %538 : vector<10x1xi32>
    %540 = vector.extract_strided_slice %521 {offsets = [0, 32], sizes = [1, 32], strides = [1, 1]} : vector<2x64xf32> to vector<1x32xf32>
    %541 = vector.shape_cast %539 : vector<10x1xi1> to vector<10x1xi1>
    %542 = vector.broadcast %541 : vector<10x1xi1> to vector<10x32xi1>
    %543 = vector.shape_cast %540 : vector<1x32xf32> to vector<1x32xf32>
    %544 = vector.broadcast %543 : vector<1x32xf32> to vector<10x32xf32>
    %545 = arith.select %542, %544, %485 : vector<10x32xi1>, vector<10x32xf32>
    %c1_i32_74 = arith.constant 1 : i32
    %546 = vector.broadcast %c1_i32_74 : i32 to vector<10x1xi32>
    %547 = arith.cmpi eq, %13, %546 : vector<10x1xi32>
    %548 = vector.extract_strided_slice %521 {offsets = [1, 32], sizes = [1, 32], strides = [1, 1]} : vector<2x64xf32> to vector<1x32xf32>
    %549 = vector.shape_cast %547 : vector<10x1xi1> to vector<10x1xi1>
    %550 = vector.broadcast %549 : vector<10x1xi1> to vector<10x32xi1>
    %551 = vector.shape_cast %548 : vector<1x32xf32> to vector<1x32xf32>
    %552 = vector.broadcast %551 : vector<1x32xf32> to vector<10x32xf32>
    %553 = arith.select %550, %552, %493 : vector<10x32xi1>, vector<10x32xf32>
    %554 = vector.extract_strided_slice %6 {offsets = [18, 0], sizes = [2, 256], strides = [1, 1]} : vector<20x256xf32> to vector<2x256xf32>
    %cst_75 = arith.constant dense<0.000000e+00> : vector<2x256xf32>
    %555 = tpu.matmul %521, %0, %cst_75 {dimension_numbers = #tpu.dot_dimension_numbers<[1], [0], [0], [1], [0, 0, 1, 1], [], []>} : vector<2x64xf32>, vector<64x256xf32>, vector<2x256xf32> -> vector<2x256xf32>
    %556 = arith.addf %554, %555 : vector<2x256xf32>
    %557 = vector.extract_strided_slice %556 {offsets = [0, 0], sizes = [2, 64], strides = [1, 1]} : vector<2x256xf32> to vector<2x64xf32>
    %558 = arith.negf %557 : vector<2x64xf32>
    %559 = math.exp %558 : vector<2x64xf32>
    %cst_76 = arith.constant 1.000000e+00 : f32
    %560 = vector.broadcast %cst_76 : f32 to vector<2x64xf32>
    %561 = arith.addf %560, %559 : vector<2x64xf32>
    %562 = arith.divf %560, %561 : vector<2x64xf32>
    %563 = vector.extract_strided_slice %556 {offsets = [0, 64], sizes = [2, 64], strides = [1, 1]} : vector<2x256xf32> to vector<2x64xf32>
    %564 = arith.negf %563 : vector<2x64xf32>
    %565 = math.exp %564 : vector<2x64xf32>
    %cst_77 = arith.constant 1.000000e+00 : f32
    %566 = vector.broadcast %cst_77 : f32 to vector<2x64xf32>
    %567 = arith.addf %566, %565 : vector<2x64xf32>
    %568 = arith.divf %566, %567 : vector<2x64xf32>
    %569 = vector.extract_strided_slice %556 {offsets = [0, 128], sizes = [2, 64], strides = [1, 1]} : vector<2x256xf32> to vector<2x64xf32>
    %570 = math.tanh %569 : vector<2x64xf32>
    %571 = vector.extract_strided_slice %556 {offsets = [0, 192], sizes = [2, 64], strides = [1, 1]} : vector<2x256xf32> to vector<2x64xf32>
    %572 = arith.negf %571 : vector<2x64xf32>
    %573 = math.exp %572 : vector<2x64xf32>
    %cst_78 = arith.constant 1.000000e+00 : f32
    %574 = vector.broadcast %cst_78 : f32 to vector<2x64xf32>
    %575 = arith.addf %574, %573 : vector<2x64xf32>
    %576 = arith.divf %574, %575 : vector<2x64xf32>
    %577 = arith.mulf %568, %519 : vector<2x64xf32>
    %578 = arith.mulf %562, %570 : vector<2x64xf32>
    %579 = arith.addf %577, %578 : vector<2x64xf32>
    %580 = math.tanh %579 : vector<2x64xf32>
    %581 = arith.mulf %576, %580 : vector<2x64xf32>
    %c9_i32_79 = arith.constant 9 : i32
    %582 = vector.broadcast %c9_i32_79 : i32 to vector<10x1xi32>
    %583 = arith.cmpi eq, %13, %582 : vector<10x1xi32>
    %584 = vector.extract_strided_slice %581 {offsets = [0, 0], sizes = [1, 32], strides = [1, 1]} : vector<2x64xf32> to vector<1x32xf32>
    %585 = vector.shape_cast %583 : vector<10x1xi1> to vector<10x1xi1>
    %586 = vector.broadcast %585 : vector<10x1xi1> to vector<10x32xi1>
    %587 = vector.shape_cast %584 : vector<1x32xf32> to vector<1x32xf32>
    %588 = vector.broadcast %587 : vector<1x32xf32> to vector<10x32xf32>
    %589 = arith.select %586, %588, %529 : vector<10x32xi1>, vector<10x32xf32>
    %c9_i32_80 = arith.constant 9 : i32
    %590 = vector.broadcast %c9_i32_80 : i32 to vector<10x1xi32>
    %591 = arith.cmpi eq, %13, %590 : vector<10x1xi32>
    %592 = vector.extract_strided_slice %581 {offsets = [1, 0], sizes = [1, 32], strides = [1, 1]} : vector<2x64xf32> to vector<1x32xf32>
    %593 = vector.shape_cast %591 : vector<10x1xi1> to vector<10x1xi1>
    %594 = vector.broadcast %593 : vector<10x1xi1> to vector<10x32xi1>
    %595 = vector.shape_cast %592 : vector<1x32xf32> to vector<1x32xf32>
    %596 = vector.broadcast %595 : vector<1x32xf32> to vector<10x32xf32>
    %597 = arith.select %594, %596, %537 : vector<10x32xi1>, vector<10x32xf32>
    %c0_i32_81 = arith.constant 0 : i32
    %598 = vector.broadcast %c0_i32_81 : i32 to vector<10x1xi32>
    %599 = arith.cmpi eq, %13, %598 : vector<10x1xi32>
    %600 = vector.extract_strided_slice %581 {offsets = [0, 32], sizes = [1, 32], strides = [1, 1]} : vector<2x64xf32> to vector<1x32xf32>
    %601 = vector.shape_cast %599 : vector<10x1xi1> to vector<10x1xi1>
    %602 = vector.broadcast %601 : vector<10x1xi1> to vector<10x32xi1>
    %603 = vector.shape_cast %600 : vector<1x32xf32> to vector<1x32xf32>
    %604 = vector.broadcast %603 : vector<1x32xf32> to vector<10x32xf32>
    %605 = arith.select %602, %604, %545 : vector<10x32xi1>, vector<10x32xf32>
    %c0_i32_82 = arith.constant 0 : i32
    %606 = vector.broadcast %c0_i32_82 : i32 to vector<10x1xi32>
    %607 = arith.cmpi eq, %13, %606 : vector<10x1xi32>
    %608 = vector.extract_strided_slice %581 {offsets = [1, 32], sizes = [1, 32], strides = [1, 1]} : vector<2x64xf32> to vector<1x32xf32>
    %609 = vector.shape_cast %607 : vector<10x1xi1> to vector<10x1xi1>
    %610 = vector.broadcast %609 : vector<10x1xi1> to vector<10x32xi1>
    %611 = vector.shape_cast %608 : vector<1x32xf32> to vector<1x32xf32>
    %612 = vector.broadcast %611 : vector<1x32xf32> to vector<10x32xf32>
    %613 = arith.select %610, %612, %553 : vector<10x32xi1>, vector<10x32xf32>
    %614 = arith.mulf %589, %589 : vector<10x32xf32>
    %cst_83 = arith.constant dense<0.000000e+00> : vector<10xf32>
    %615 = vector.multi_reduction <add>, %614, %cst_83 [1] : vector<10x32xf32> to vector<10xf32>
    %616 = vector.shape_cast %615 : vector<10xf32> to vector<10x1xf32>
    %617 = arith.mulf %605, %605 : vector<10x32xf32>
    %cst_84 = arith.constant dense<0.000000e+00> : vector<10xf32>
    %618 = vector.multi_reduction <add>, %617, %cst_84 [1] : vector<10x32xf32> to vector<10xf32>
    %619 = vector.shape_cast %618 : vector<10xf32> to vector<10x1xf32>
    %620 = arith.addf %616, %619 : vector<10x1xf32>
    %621 = math.sqrt %620 : vector<10x1xf32>
    %cst_85 = arith.constant 9.99999996E-13 : f32
    %622 = vector.broadcast %cst_85 : f32 to vector<10x1xf32>
    %623 = arith.maximumf %621, %622 : vector<10x1xf32>
    %624 = arith.mulf %597, %597 : vector<10x32xf32>
    %cst_86 = arith.constant dense<0.000000e+00> : vector<10xf32>
    %625 = vector.multi_reduction <add>, %624, %cst_86 [1] : vector<10x32xf32> to vector<10xf32>
    %626 = vector.shape_cast %625 : vector<10xf32> to vector<10x1xf32>
    %627 = arith.mulf %613, %613 : vector<10x32xf32>
    %cst_87 = arith.constant dense<0.000000e+00> : vector<10xf32>
    %628 = vector.multi_reduction <add>, %627, %cst_87 [1] : vector<10x32xf32> to vector<10xf32>
    %629 = vector.shape_cast %628 : vector<10xf32> to vector<10x1xf32>
    %630 = arith.addf %626, %629 : vector<10x1xf32>
    %631 = math.sqrt %630 : vector<10x1xf32>
    %cst_88 = arith.constant 9.99999996E-13 : f32
    %632 = vector.broadcast %cst_88 : f32 to vector<10x1xf32>
    %633 = arith.maximumf %631, %632 : vector<10x1xf32>
    %634 = vector.broadcast %623 : vector<10x1xf32> to vector<10x32xf32>
    %635 = arith.divf %589, %634 : vector<10x32xf32>
    %636 = vector.broadcast %623 : vector<10x1xf32> to vector<10x32xf32>
    %637 = arith.divf %605, %636 : vector<10x32xf32>
    %638 = vector.broadcast %633 : vector<10x1xf32> to vector<10x32xf32>
    %639 = arith.divf %597, %638 : vector<10x32xf32>
    %640 = vector.broadcast %633 : vector<10x1xf32> to vector<10x32xf32>
    %641 = arith.divf %613, %640 : vector<10x32xf32>
    %cst_89 = arith.constant dense<0.000000e+00> : vector<10x10xf32>
    %642 = tpu.matmul %635, %639, %cst_89 {dimension_numbers = #tpu.dot_dimension_numbers<[1], [1], [0], [0], [0, 0, 1, 0], [], []>} : vector<10x32xf32>, vector<10x32xf32>, vector<10x10xf32> -> vector<10x10xf32>
    %cst_90 = arith.constant dense<0.000000e+00> : vector<10x10xf32>
    %643 = tpu.matmul %637, %641, %cst_90 {dimension_numbers = #tpu.dot_dimension_numbers<[1], [1], [0], [0], [0, 0, 1, 0], [], []>} : vector<10x32xf32>, vector<10x32xf32>, vector<10x10xf32> -> vector<10x10xf32>
    %644 = arith.addf %642, %643 : vector<10x10xf32>
    %645 = vector.shape_cast %644 : vector<10x10xf32> to vector<1x10x10xf32>
    %cst_91 = arith.constant dense<0xFF800000> : vector<1xf32>
    %646 = vector.multi_reduction <maximumf>, %645, %cst_91 [1, 2] : vector<1x10x10xf32> to vector<1xf32>
    %647 = vector.shape_cast %646 : vector<1xf32> to vector<1x1x1xf32>
    %648 = vector.extract %647[0, 0, 0] : f32 from vector<1x1x1xf32>
    %649 = vector.broadcast %648 : f32 to vector<10x10xf32>
    %650 = arith.cmpf oge, %644, %649 : vector<10x10xf32>
    %cst_92 = arith.constant 0xFF800000 : f32
    %651 = vector.broadcast %cst_92 : f32 to vector<10x10xf32>
    %652 = arith.select %650, %651, %644 : vector<10x10xi1>, vector<10x10xf32>
    %653 = vector.shape_cast %652 : vector<10x10xf32> to vector<1x10x10xf32>
    %cst_93 = arith.constant dense<0xFF800000> : vector<1xf32>
    %654 = vector.multi_reduction <maximumf>, %653, %cst_93 [1, 2] : vector<1x10x10xf32> to vector<1xf32>
    %655 = vector.shape_cast %654 : vector<1xf32> to vector<1x1x1xf32>
    %656 = vector.extract %655[0, 0, 0] : f32 from vector<1x1x1xf32>
    %657 = vector.broadcast %656 : f32 to vector<10x10xf32>
    %658 = arith.cmpf oge, %652, %657 : vector<10x10xf32>
    %cst_94 = arith.constant 0xFF800000 : f32
    %659 = vector.broadcast %cst_94 : f32 to vector<10x10xf32>
    %660 = arith.select %658, %659, %652 : vector<10x10xi1>, vector<10x10xf32>
    %661 = vector.shape_cast %660 : vector<10x10xf32> to vector<1x10x10xf32>
    %cst_95 = arith.constant dense<0xFF800000> : vector<1xf32>
    %662 = vector.multi_reduction <maximumf>, %661, %cst_95 [1, 2] : vector<1x10x10xf32> to vector<1xf32>
    %663 = vector.shape_cast %662 : vector<1xf32> to vector<1x1x1xf32>
    %664 = vector.extract %663[0, 0, 0] : f32 from vector<1x1x1xf32>
    %665 = vector.broadcast %664 : f32 to vector<10x10xf32>
    %666 = arith.cmpf oge, %660, %665 : vector<10x10xf32>
    %cst_96 = arith.constant 0xFF800000 : f32
    %667 = vector.broadcast %cst_96 : f32 to vector<10x10xf32>
    %668 = arith.select %666, %667, %660 : vector<10x10xi1>, vector<10x10xf32>
    %669 = vector.shape_cast %668 : vector<10x10xf32> to vector<1x10x10xf32>
    %cst_97 = arith.constant dense<0xFF800000> : vector<1xf32>
    %670 = vector.multi_reduction <maximumf>, %669, %cst_97 [1, 2] : vector<1x10x10xf32> to vector<1xf32>
    %671 = vector.shape_cast %670 : vector<1xf32> to vector<1x1x1xf32>
    %672 = vector.extract %671[0, 0, 0] : f32 from vector<1x1x1xf32>
    %673 = vector.broadcast %672 : f32 to vector<10x10xf32>
    %674 = arith.cmpf oge, %668, %673 : vector<10x10xf32>
    %cst_98 = arith.constant 0xFF800000 : f32
    %675 = vector.broadcast %cst_98 : f32 to vector<10x10xf32>
    %676 = arith.select %674, %675, %668 : vector<10x10xi1>, vector<10x10xf32>
    %677 = vector.shape_cast %676 : vector<10x10xf32> to vector<1x10x10xf32>
    %cst_99 = arith.constant dense<0xFF800000> : vector<1xf32>
    %678 = vector.multi_reduction <maximumf>, %677, %cst_99 [1, 2] : vector<1x10x10xf32> to vector<1xf32>
    %679 = vector.shape_cast %678 : vector<1xf32> to vector<1x1x1xf32>
    %680 = vector.extract %679[0, 0, 0] : f32 from vector<1x1x1xf32>
    %681 = vector.broadcast %680 : f32 to vector<10x10xf32>
    %682 = arith.cmpf oge, %644, %681 : vector<10x10xf32>
    %683 = arith.extui %682 : vector<10x10xi1> to vector<10x10xi32>
    %684 = arith.sitofp %683 : vector<10x10xi32> to vector<10x10xf32>
    %cst_100 = arith.constant dense<0.000000e+00> : vector<10xf32>
    %685 = vector.multi_reduction <add>, %684, %cst_100 [1] : vector<10x10xf32> to vector<10xf32>
    %686 = vector.shape_cast %685 : vector<10xf32> to vector<10x1xf32>
    %c0_101 = arith.constant 0 : index
    %c0_102 = arith.constant 0 : index
    %687 = vector.load %arg4[%c0_101, %c0_102] : memref<10x10xf32, #tpu.memory_space<vmem>>, vector<10x10xf32>
    %cst_103 = arith.constant dense<0.000000e+00> : vector<10x1xf32>
    %688 = tpu.matmul %687, %686, %cst_103 {dimension_numbers = #tpu.dot_dimension_numbers<[1], [0], [0], [1], [0, 0, 1, 1], [], []>} : vector<10x10xf32>, vector<10x1xf32>, vector<10x1xf32> -> vector<10x1xf32>
    %c0_104 = arith.constant 0 : index
    %c0_105 = arith.constant 0 : index
    %689 = vector.load %arg5[%c0_104, %c0_105] : memref<10x10xf32, #tpu.memory_space<vmem>>, vector<10x10xf32>
    %cst_106 = arith.constant dense<0.000000e+00> : vector<10x10xf32>
    %690 = tpu.matmul %684, %689, %cst_106 {dimension_numbers = #tpu.dot_dimension_numbers<[1], [0], [0], [1], [0, 0, 1, 1], [], []>} : vector<10x10xf32>, vector<10x10xf32>, vector<10x10xf32> -> vector<10x10xf32>
    %691 = vector.broadcast %688 : vector<10x1xf32> to vector<10x10xf32>
    %692 = arith.addf %691, %690 : vector<10x10xf32>
    %693 = arith.mulf %684, %644 : vector<10x10xf32>
    %cst_107 = arith.constant 0.000000e+00 : f32
    %694 = vector.broadcast %cst_107 : f32 to vector<1x2xf32>
    %cst_108 = arith.constant 0.000000e+00 : f32
    %695 = vector.broadcast %cst_108 : f32 to vector<10x10xf32>
    %696 = arith.subf %692, %695 : vector<10x10xf32>
    %697 = math.absf %696 : vector<10x10xf32>
    %cst_109 = arith.constant 5.000000e-01 : f32
    %698 = vector.broadcast %cst_109 : f32 to vector<10x10xf32>
    %699 = arith.cmpf olt, %697, %698 : vector<10x10xf32>
    %700 = arith.extui %699 : vector<10x10xi1> to vector<10x10xi32>
    %701 = arith.sitofp %700 : vector<10x10xi32> to vector<10x10xf32>
    %702 = arith.mulf %693, %701 : vector<10x10xf32>
    %703 = vector.shape_cast %702 : vector<10x10xf32> to vector<1x10x10xf32>
    %cst_110 = arith.constant dense<0.000000e+00> : vector<1xf32>
    %704 = vector.multi_reduction <add>, %703, %cst_110 [1, 2] : vector<1x10x10xf32> to vector<1xf32>
    %705 = vector.shape_cast %704 : vector<1xf32> to vector<1x1x1xf32>
    %706 = vector.extract %705[0, 0, 0] : f32 from vector<1x1x1xf32>
    %c0_111 = arith.constant 0 : index
    %c0_112 = arith.constant 0 : index
    %707 = vector.load %arg6[%c0_111, %c0_112] : memref<5x2xf32, #tpu.memory_space<vmem>>, vector<1x2xf32>
    %708 = vector.broadcast %706 : f32 to vector<1x2xf32>
    %709 = arith.mulf %708, %707 : vector<1x2xf32>
    %710 = arith.addf %694, %709 : vector<1x2xf32>
    %cst_113 = arith.constant 1.000000e+00 : f32
    %711 = vector.broadcast %cst_113 : f32 to vector<10x10xf32>
    %712 = arith.subf %692, %711 : vector<10x10xf32>
    %713 = math.absf %712 : vector<10x10xf32>
    %cst_114 = arith.constant 5.000000e-01 : f32
    %714 = vector.broadcast %cst_114 : f32 to vector<10x10xf32>
    %715 = arith.cmpf olt, %713, %714 : vector<10x10xf32>
    %716 = arith.extui %715 : vector<10x10xi1> to vector<10x10xi32>
    %717 = arith.sitofp %716 : vector<10x10xi32> to vector<10x10xf32>
    %718 = arith.mulf %693, %717 : vector<10x10xf32>
    %719 = vector.shape_cast %718 : vector<10x10xf32> to vector<1x10x10xf32>
    %cst_115 = arith.constant dense<0.000000e+00> : vector<1xf32>
    %720 = vector.multi_reduction <add>, %719, %cst_115 [1, 2] : vector<1x10x10xf32> to vector<1xf32>
    %721 = vector.shape_cast %720 : vector<1xf32> to vector<1x1x1xf32>
    %722 = vector.extract %721[0, 0, 0] : f32 from vector<1x1x1xf32>
    %c1 = arith.constant 1 : index
    %c0_116 = arith.constant 0 : index
    %723 = vector.load %arg6[%c1, %c0_116] : memref<5x2xf32, #tpu.memory_space<vmem>>, vector<1x2xf32>
    %724 = vector.broadcast %722 : f32 to vector<1x2xf32>
    %725 = arith.mulf %724, %723 : vector<1x2xf32>
    %726 = arith.addf %710, %725 : vector<1x2xf32>
    %cst_117 = arith.constant 2.000000e+00 : f32
    %727 = vector.broadcast %cst_117 : f32 to vector<10x10xf32>
    %728 = arith.subf %692, %727 : vector<10x10xf32>
    %729 = math.absf %728 : vector<10x10xf32>
    %cst_118 = arith.constant 5.000000e-01 : f32
    %730 = vector.broadcast %cst_118 : f32 to vector<10x10xf32>
    %731 = arith.cmpf olt, %729, %730 : vector<10x10xf32>
    %732 = arith.extui %731 : vector<10x10xi1> to vector<10x10xi32>
    %733 = arith.sitofp %732 : vector<10x10xi32> to vector<10x10xf32>
    %734 = arith.mulf %693, %733 : vector<10x10xf32>
    %735 = vector.shape_cast %734 : vector<10x10xf32> to vector<1x10x10xf32>
    %cst_119 = arith.constant dense<0.000000e+00> : vector<1xf32>
    %736 = vector.multi_reduction <add>, %735, %cst_119 [1, 2] : vector<1x10x10xf32> to vector<1xf32>
    %737 = vector.shape_cast %736 : vector<1xf32> to vector<1x1x1xf32>
    %738 = vector.extract %737[0, 0, 0] : f32 from vector<1x1x1xf32>
    %c2 = arith.constant 2 : index
    %c0_120 = arith.constant 0 : index
    %739 = vector.load %arg6[%c2, %c0_120] : memref<5x2xf32, #tpu.memory_space<vmem>>, vector<1x2xf32>
    %740 = vector.broadcast %738 : f32 to vector<1x2xf32>
    %741 = arith.mulf %740, %739 : vector<1x2xf32>
    %742 = arith.addf %726, %741 : vector<1x2xf32>
    %cst_121 = arith.constant 3.000000e+00 : f32
    %743 = vector.broadcast %cst_121 : f32 to vector<10x10xf32>
    %744 = arith.subf %692, %743 : vector<10x10xf32>
    %745 = math.absf %744 : vector<10x10xf32>
    %cst_122 = arith.constant 5.000000e-01 : f32
    %746 = vector.broadcast %cst_122 : f32 to vector<10x10xf32>
    %747 = arith.cmpf olt, %745, %746 : vector<10x10xf32>
    %748 = arith.extui %747 : vector<10x10xi1> to vector<10x10xi32>
    %749 = arith.sitofp %748 : vector<10x10xi32> to vector<10x10xf32>
    %750 = arith.mulf %693, %749 : vector<10x10xf32>
    %751 = vector.shape_cast %750 : vector<10x10xf32> to vector<1x10x10xf32>
    %cst_123 = arith.constant dense<0.000000e+00> : vector<1xf32>
    %752 = vector.multi_reduction <add>, %751, %cst_123 [1, 2] : vector<1x10x10xf32> to vector<1xf32>
    %753 = vector.shape_cast %752 : vector<1xf32> to vector<1x1x1xf32>
    %754 = vector.extract %753[0, 0, 0] : f32 from vector<1x1x1xf32>
    %c3 = arith.constant 3 : index
    %c0_124 = arith.constant 0 : index
    %755 = vector.load %arg6[%c3, %c0_124] : memref<5x2xf32, #tpu.memory_space<vmem>>, vector<1x2xf32>
    %756 = vector.broadcast %754 : f32 to vector<1x2xf32>
    %757 = arith.mulf %756, %755 : vector<1x2xf32>
    %758 = arith.addf %742, %757 : vector<1x2xf32>
    %cst_125 = arith.constant 4.000000e+00 : f32
    %759 = vector.broadcast %cst_125 : f32 to vector<10x10xf32>
    %760 = arith.subf %692, %759 : vector<10x10xf32>
    %761 = math.absf %760 : vector<10x10xf32>
    %cst_126 = arith.constant 5.000000e-01 : f32
    %762 = vector.broadcast %cst_126 : f32 to vector<10x10xf32>
    %763 = arith.cmpf olt, %761, %762 : vector<10x10xf32>
    %764 = arith.extui %763 : vector<10x10xi1> to vector<10x10xi32>
    %765 = arith.sitofp %764 : vector<10x10xi32> to vector<10x10xf32>
    %766 = arith.mulf %693, %765 : vector<10x10xf32>
    %767 = vector.shape_cast %766 : vector<10x10xf32> to vector<1x10x10xf32>
    %cst_127 = arith.constant dense<0.000000e+00> : vector<1xf32>
    %768 = vector.multi_reduction <add>, %767, %cst_127 [1, 2] : vector<1x10x10xf32> to vector<1xf32>
    %769 = vector.shape_cast %768 : vector<1xf32> to vector<1x1x1xf32>
    %770 = vector.extract %769[0, 0, 0] : f32 from vector<1x1x1xf32>
    %c4 = arith.constant 4 : index
    %c0_128 = arith.constant 0 : index
    %771 = vector.load %arg6[%c4, %c0_128] : memref<5x2xf32, #tpu.memory_space<vmem>>, vector<1x2xf32>
    %772 = vector.broadcast %770 : f32 to vector<1x2xf32>
    %773 = arith.mulf %772, %771 : vector<1x2xf32>
    %774 = arith.addf %758, %773 : vector<1x2xf32>
    %c0_129 = arith.constant 0 : index
    %c0_130 = arith.constant 0 : index
    %775 = vector.load %arg7[%c0_129, %c0_130] : memref<1x2xf32, #tpu.memory_space<vmem>>, vector<1x2xf32>
    %776 = arith.addf %774, %775 : vector<1x2xf32>
    %c0_131 = arith.constant 0 : index
    %c0_132 = arith.constant 0 : index
    %777 = vector.load %arg8[%c0_131, %c0_132] : memref<1x2xf32, #tpu.memory_space<vmem>>, vector<1x2xf32>
    tpu.vector_store %arg8[%c0_131, %c0_132], %776 {strides = array<i32>} : memref<1x2xf32, #tpu.memory_space<vmem>>, vector<1x2xf32>,
    return
  }
}

</mosaic_0001>

<bundles_post_ra>
// kernel: mvlstm_forward.1
= control target key start
LH: loop header
LB: loop body
LE: loop exit
PB: predicated region body
PF: predicated region fallthrough
CT: control target
= control target key end

     0   :  { %v2515_v4 = vmov 0.0   ;;  %s3348_s0 = inlined_call_operand.vmem [shape: f32[20,128], index: 0, kind: input, shape index: {}]   ;;  %s3349_s1 = inlined_call_operand.vmem [shape: f32[128,256], index: 1, kind: input, shape index: {}]   ;;  %s3350_s2 = inlined_call_operand.vmem [shape: f32[64,256], index: 2, kind: input, shape index: {}]   ;;  %s3351_s3 = inlined_call_operand.vmem [shape: f32[1,256], index: 3, kind: input, shape index: {}]   ;;  %s3352_s4 = inlined_call_operand.vmem [shape: f32[10,10], index: 4, kind: input, shape index: {}]   ;;  %s3353_s5 = inlined_call_operand.vmem [shape: f32[10,10], index: 5, kind: input, shape index: {}]   ;;  %s3354_s6 = inlined_call_operand.vmem [shape: f32[5,2], index: 6, kind: input, shape index: {}]   ;;  %s3355_s7 = inlined_call_operand.vmem [shape: f32[1,2], index: 7, kind: input, shape index: {}]   ;;  %s3356_s8 = inlined_call_operand.hbm [shape: f32[1,2], index: 8, kind: output, shape index: {}]  }
   0x1   :  { %v80_v0 = vld [vmem:[%s3349_s1 + $0xf8] sm:$0xff]  ;;  %v79_v1 = vld [vmem:[%s3349_s1 + $0xf0] sm:$0xff]  ;;  %v78_v2 = vld [vmem:[%s3349_s1 + $0xe8] sm:$0xff]  ;;  %157 = vmatprep.mubr.f32.mxu0 %v2515_v4  ;;  %247 = vmatprep.mubr.f32.mxu1 %v2515_v4 }
   0x2   :  { %93 = vmatprep.subr.mxu0 %v80_v0  ;;  %v77_v3 = vld [vmem:[%s3349_s1 + $0xe0] sm:$0xff]  ;;  %v76_v5 = vld [vmem:[%s3349_s1 + $0xd8] sm:$0xff]  ;;  %v75_v6 = vld [vmem:[%s3349_s1 + $0xd0] sm:$0xff] }
   0x3   :  { %94 = vmatpush1.msra.mxu0 %v79_v1  ;;  %v74_v7 = vld [vmem:[%s3349_s1 + $0xc8] sm:$0xff]  ;;  %v73_v8 = vld [vmem:[%s3349_s1 + $0xc0] sm:$0xff]  ;;  %v2594_v9 = vld [vmem:[%s3350_s2 + $0x78] sm:$0xff] }
   0x4   :  { %95 = vmatprep.subr.mxu0 %v78_v2  ;;  %v72_v10 = vld [vmem:[%s3349_s1 + $0xb8] sm:$0xff]  ;;  %199 = vmatprep.subr.mxu1 %v2594_v9  ;;  %v2603_v11 = vld [vmem:[%s3350_s2 + $0x70] sm:$0xff]  ;;  %v2612_v13 = vld [vmem:[%s3350_s2 + $0x68] sm:$0xff] }
   0x5   :  { %96 = vmatpush1.msra.mxu0 %v77_v3  ;;  %v71_v12 = vld [vmem:[%s3349_s1 + $0xb0] sm:$0xff]  ;;  %200 = vmatpush1.msra.mxu1 %v2603_v11  ;;  %v2617_v14 = vld [vmem:[%s3350_s2 + $0x60] sm:$0xff]  ;;  %v70_v15 = vld [vmem:[%s3349_s1 + $0xa8] sm:$0xff] }
   0x6   :  { %97 = vmatprep.subr.mxu0 %v76_v5  ;;  %201 = vmatprep.subr.mxu1 %v2612_v13  ;;  %v2626_v16 = vld [vmem:[%s3350_s2 + $0x58] sm:$0xff]  ;;  %v69_v17 = vld [vmem:[%s3349_s1 + $0xa0] sm:$0xff]  ;;  %v2635_v18 = vld [vmem:[%s3350_s2 + $0x50] sm:$0xff] }
   0x7   :  { %98 = vmatpush1.msra.mxu0 %v75_v6  ;;  %202 = vmatpush1.msra.mxu1 %v2617_v14  ;;  %v2640_v19 = vld [vmem:[%s3350_s2 + $0x48] sm:$0xff]  ;;  %v68_v20 = vld [vmem:[%s3349_s1 + $0x98] sm:$0xff]  ;;  %v2649_v21 = vld [vmem:[%s3350_s2 + $0x40] sm:$0xff] }
   0x8   :  { %99 = vmatprep.subr.mxu0 %v74_v7  ;;  %203 = vmatprep.subr.mxu1 %v2626_v16  ;;  %v67_v22 = vld [vmem:[%s3349_s1 + $0x90] sm:$0xff]  ;;  %v2658_v23 = vld [vmem:[%s3350_s2 + $0x38] sm:$0xff]  ;;  %v66_v24 = vld [vmem:[%s3349_s1 + $0x88] sm:$0xff] }
   0x9   :  { %100 = vmatpush1.msra.mxu0 %v73_v8  ;;  %204 = vmatpush1.msra.mxu1 %v2635_v18  ;;  %v2667_v25 = vld [vmem:[%s3350_s2 + $0x30] sm:$0xff]  ;;  %v65_v26 = vld [vmem:[%s3349_s1 + $0x80] sm:$0xff]  ;;  %v2676_v27 = vld [vmem:[%s3350_s2 + $0x28] sm:$0xff] }
   0xa   :  { %101 = vmatprep.subr.mxu0 %v72_v10  ;;  %205 = vmatprep.subr.mxu1 %v2640_v19  ;;  %v64_v28 = vld [vmem:[%s3349_s1 + $0x78] sm:$0xff]  ;;  %v2685_v29 = vld [vmem:[%s3350_s2 + $0x20] sm:$0xff]  ;;  %v63_v30 = vld [vmem:[%s3349_s1 + $0x70] sm:$0xff] }
   0xb   :  { %102 = vmatpush1.msra.mxu0 %v71_v12  ;;  %206 = vmatpush1.msra.mxu1 %v2649_v21  ;;  %v2694_v31 = vld [vmem:[%s3350_s2 + $0x18] sm:$0xff]  ;;  %v62_v32 = vld [vmem:[%s3349_s1 + $0x68] sm:$0xff]  ;;  %v2703_v33 = vld [vmem:[%s3350_s2 + $0x10] sm:$0xff] }
   0xc   :  { %103 = vmatprep.subr.mxu0 %v70_v15  ;;  %207 = vmatprep.subr.mxu1 %v2658_v23 }
   0xd   :  { %104 = vmatpush1.msra.mxu0 %v69_v17  ;;  %208 = vmatpush1.msra.mxu1 %v2667_v25 }
   0xe   :  { %105 = vmatprep.subr.mxu0 %v68_v20  ;;  %209 = vmatprep.subr.mxu1 %v2676_v27 }
   0xf   :  { %106 = vmatpush1.msra.mxu0 %v67_v22 }
  0x10   :  { %107 = vmatprep.subr.mxu0 %v66_v24 }
  0x11   :  { %108 = vmatpush1.msra.mxu0 %v65_v26 }
  0x12   :  { %13 = vsyncpa [#allocation3], 0  ;;  %109 = vmatprep.subr.mxu0 %v64_v28  ;;  %v61_v34 = vld [vmem:[%s3349_s1 + $0x60] sm:$0xff]  ;;  %210 = vmatpush1.msra.mxu1 %v2685_v29  ;;  %v2712_v35 = vld [vmem:[%s3350_s2 + $0x8] sm:$0xff]  ;;  %v83_v50 = vlaneseq  ;;  %vm179_vm0 = vcmask 523264   ;;  %vm1487_vm11 = vcmask 254976  }
  0x13   :  { %110 = vmatpush1.msra.mxu0 %v63_v30  ;;  %v60_v36 = vld [vmem:[%s3349_s1 + $0x58] sm:$0xff]  ;;  %211 = vmatprep.subr.mxu1 %v2694_v31  ;;  %v2721_v37 = vld [vmem:[%s3350_s2] sm:$0xff]  ;;  %v59_v38 = vld [vmem:[%s3349_s1 + $0x50] sm:$0xff]  ;;  %vm1483_vm12 = vcmask 261120  }
  0x14   :  { %111 = vmatprep.subr.mxu0 %v62_v32  ;;  %212 = vmatpush1.msra.mxu1 %v2703_v33  ;;  %v58_v39 = vld [vmem:[%s3349_s1 + $0x48] sm:$0xff]  ;;  %v57_v40 = vld [vmem:[%s3349_s1 + $0x40] sm:$0xff]  ;;  %v56_v41 = vld [vmem:[%s3349_s1 + $0x38] sm:$0xff]  ;;  %v2799_v51 = vshrl.u32 %v83_v50, 7 }
  0x15   :  { %112 = vmatpush1.msra.mxu0 %v61_v34  ;;  %213 = vmatprep.subr.mxu1 %v2712_v35  ;;  %v55_v42 = vld [vmem:[%s3349_s1 + $0x30] sm:$0xff]  ;;  %v54_v43 = vld [vmem:[%s3349_s1 + $0x28] sm:$0xff]  ;;  %v53_v44 = vld [vmem:[%s3349_s1 + $0x20] sm:$0xff] }
  0x16   :  { %113 = vmatprep.subr.mxu0 %v60_v36  ;;  %214 = vmatpush1.msra.mxu1 %v2721_v37  ;;  %v52_v45 = vld [vmem:[%s3349_s1 + $0x18] sm:$0xff]  ;;  %v51_v46 = vld [vmem:[%s3349_s1 + $0x10] sm:$0xff]  ;;  %v50_v47 = vld [vmem:[%s3349_s1 + $0x8] sm:$0xff]  ;;  %v2802_v52 = vsub.s32 0, %v2799_v51  ;;  %v2815_v60 = vsub.s32 1, %v2799_v51  ;;  %vm278_vm1 = vcmp.eq.s32.totalorder %v2799_v51, 0 }
  0x17   :  { %114 = vmatpush1.msra.mxu0 %v59_v38  ;;  %248 = vmatmul.mubr.f32.vlgmr.msra.gmra.mxu1 %v2515_v4  ;;  %v49_v48 = vld [vmem:[%s3349_s1] sm:$0xff]  ;;  %vm415_vm3 = vcmp.eq.s32.totalorder %v2799_v51, 1  ;;  %vm553_vm5 = vcmp.eq.s32.totalorder %v2799_v51, 2  ;;  %vm571_vm6 = vcmp.eq.s32.totalorder %v2799_v51, 7  ;;  %vm691_vm7 = vcmp.eq.s32.totalorder %v2799_v51, 3 }
  0x18   :  { %115 = vmatprep.subr.mxu0 %v58_v39  ;;  %327 = vmatprep.subr.mxu1 %v2594_v9  ;;  %v46_v49 = vld [vmem:[%s3348_s0] sm:$0xff]  ;;  %vm709_vm8 = vcmp.eq.s32.totalorder %v2799_v51, 6  ;;  %vm823_vm9 = vcmp.eq.s32.totalorder %v2799_v51, 4  ;;  %vm841_vm10 = vcmp.eq.s32.totalorder %v2799_v51, 5 }
  0x19   :  { %116 = vmatpush1.msra.mxu0 %v57_v40  ;;  %328 = vmatpush1.msra.mxu1 %v2603_v11  ;;  %v81_v53 = vld [vmem:[%s3351_s3] sm:$0x3]  ;;  %s2516_s3 = smov 64  }
  0x1a   :  { %117 = vmatprep.subr.mxu0 %v56_v41  ;;  %329 = vmatprep.subr.mxu1 %v2612_v13  ;;  %v2808_v54 = vrot.slane %v81_v53, %v2802_v52  ;;  %v2818_v61 = vrot.slane %v81_v53, %v2815_v60 }
  0x1b   :  { %118 = vmatpush1.msra.mxu0 %v55_v42  ;;  %330 = vmatpush1.msra.mxu1 %v2617_v14 }
  0x1c   :  { %119 = vmatprep.subr.mxu0 %v54_v43  ;;  %331 = vmatprep.subr.mxu1 %v2626_v16 }
  0x1d   :  { %120 = vmatpush1.msra.mxu0 %v53_v44  ;;  %332 = vmatpush1.msra.mxu1 %v2635_v18 }
  0x1e   :  { %121 = vmatprep.subr.mxu0 %v52_v45  ;;  %333 = vmatprep.subr.mxu1 %v2640_v19 }
  0x1f   :  { %122 = vmatpush1.msra.mxu0 %v51_v46  ;;  %334 = vmatpush1.msra.mxu1 %v2649_v21 }
  0x20   :  { %123 = vmatprep.subr.mxu0 %v50_v47  ;;  %335 = vmatprep.subr.mxu1 %v2658_v23 }
  0x21   :  { %124 = vmatpush1.msra.mxu0 %v49_v48  ;;  %336 = vmatpush1.msra.mxu1 %v2667_v25  ;;  %v47_v48 = vld [vmem:[%s3348_s0 + $0x8] sm:$0xff] }
  0x22   :  { %158 = vmatmul.mubr.f32.vlgmr.msra.gmra.mxu0 %v46_v49  ;;  %337 = vmatprep.subr.mxu1 %v2676_v27  ;;  %v48_v49 = vld [vmem:[%s3348_s0 + $0x10] sm:$0xf] }
  0x23   :  { %338 = vmatpush1.msra.mxu1 %v2685_v29  ;;  %375 = vmatprep.mubr.f32.mxu1 %v2515_v4 }
  0x24   :  { %339 = vmatprep.subr.mxu1 %v2694_v31  ;;  %465 = vmatprep.subr.mxu0 %v2594_v9 }
  0x25   :  { %340 = vmatpush1.msra.mxu1 %v2703_v33  ;;  %466 = vmatpush1.msra.mxu0 %v2603_v11 }
  0x26   :  { %341 = vmatprep.subr.mxu1 %v2712_v35  ;;  %467 = vmatprep.subr.mxu0 %v2612_v13 }
  0x27   :  { %342 = vmatpush1.msra.mxu1 %v2721_v37  ;;  %468 = vmatpush1.msra.mxu0 %v2617_v14 }
  0x28   :  { %469 = vmatprep.subr.mxu0 %v2626_v16  ;;  %163 = vmatprep.mubr.f32.mxu0 %v2515_v4 }
  0x29   :  { %470 = vmatpush1.msra.mxu0 %v2635_v18  ;;  %603 = vmatprep.subr.mxu1 %v2594_v9 }
  0x2a   :  { %471 = vmatprep.subr.mxu0 %v2640_v19  ;;  %164 = vmatmul.mubr.f32.gmra.mxu0 %v47_v48 }
  0x2b   :  { %472 = vmatpush1.msra.mxu0 %v2649_v21  ;;  %169 = vmatprep.mubr.f32.mxu0 %v2515_v4 }
  0x2c   :  { %473 = vmatprep.subr.mxu0 %v2658_v23 }
  0x2d   :  { %474 = vmatpush1.msra.mxu0 %v2667_v25 }
  0x2e   :  { %475 = vmatprep.subr.mxu0 %v2676_v27  ;;  %170 = vmatmul.mubr.f32.gmra.mxu0 %v48_v49 }
  0x2f   :  { %476 = vmatpush1.msra.mxu0 %v2685_v29  ;;  %513 = vmatprep.mubr.f32.mxu0 %v2515_v4 }
  0x30   :  { %477 = vmatprep.subr.mxu0 %v2694_v31 }
  0x31   :  { %478 = vmatpush1.msra.mxu0 %v2703_v33 }
  0x32   :  { %479 = vmatprep.subr.mxu0 %v2712_v35 }
  0x33   :  { %480 = vmatpush1.msra.mxu0 %v2721_v37 }
  0x34   :  { %741 = vmatprep.subr.mxu0 %v2594_v9 }
  0xd7   :  { %v249_v57 = vpop.f32.mrf.mxu1 }
  0xd9   :  { %v251_v0 = vpop.f32.mrf.mxu1 }
  0xe2   :  { %v159_v55 = vpop.f32.mrf.mxu0 }
  0xe3   :  { %v2811_v56 = vadd.f32 %v159_v55, %v2808_v54 }
  0xe4   :  { %v161_v62 = vpop.f32.mrf.mxu0 }
  0xe5   :  { %v254_v58 = vadd.f32 %v249_v57, %v2811_v56  ;;  %v2821_v63 = vadd.f32 %v161_v62, %v2818_v61 }
  0xe7   :  { %v2215_v59 = vmul.f32 -1.442695, %v254_v58  ;;  %v255_v1 = vadd.f32 %v251_v0, %v2821_v63  ;;  %v2862_v0 = vsub.s32 2, %v2799_v51 }
  0xe9   :  { %2349 = vpow2.f32 %v2215_v59  ;;  %v2216_v8 = vmul.f32 -1.442695, %v255_v1  ;;  %v2859_v59 = vadd.s32 8, %v2799_v51 }
  0xea   :  { %2351 = vtanh.f32 %v255_v1  ;;  %v2865_v1 = vsub.s32 3, %v2799_v51 }
  0xeb   :  { %vm297_vm2 = vcmp.eq.s32.totalorder %v2859_v59, 9  ;;  %vm434_vm4 = vcmp.eq.s32.totalorder %v2859_v59, 8 }
  0xf6   :  { %v2350_v2 = vpop.eup %2349 }
  0xf7   :  { %v259_v3 = vadd.f32 1.0, %v2350_v2  ;;  %v2352_v5 = vpop.eup %2351 }
  0xf9   :  { %2353 = vrcp.f32 %v259_v3 }
  0xfa   :  { %2355 = vpow2.f32 %v2216_v8 }
 0x106   :  { %v2354_v6 = vpop.eup %2353 }
 0x107   :  { %v270_v7 = vmul.f32 %v2354_v6, %v2352_v5  ;;  %v2356_v10 = vpop.eup %2355  ;;  %v269_v15 = vmul.f32 0.0, %v2354_v6 }
 0x108   :  { %v266_v12 = vadd.f32 1.0, %v2356_v10 }
 0x109   :  { %272 = vrot.lane.b32.xlu0 %v270_v7, %s2516_s3 }
 0x10a   :  { %2357 = vrcp.f32 %v266_v12 }
 0x117   :  { %v2358_v22 = vpop.eup %2357 }
 0x17b   :  { %v273_v17 = vpop.permute.xlu0 %272 }
 0x17c   :  { %v275_v20 = vadd.f32 %v273_v17, %v269_v15 }
 0x17e   :  { %2359 = vtanh.f32 %v275_v20  ;;  %v404_v44 = vrot.slane %v275_v20, 6 }
 0x18b   :  { %v2360_v24 = vpop.eup %2359 }
 0x18c   :  { %v277_v26 = vmul.f32 %v2360_v24, %v2358_v22 }
 0x18e   :  { %307 = vrot.lane.b32.xlu0 %v277_v26, %s2516_s3  ;;  %v287_v3 = vrot.slane %v277_v26, %v2802_v52  ;;  %v293_v5 = vrot.slane %v277_v26, %v2815_v60 }
 0x190   :  { %v288_v12 = vsel %vm278_vm1, %v287_v3, 0.0  ;;  %v294_v15 = vsel %vm278_vm1, %v293_v5, 0.0  ;;  %v305_v17 = vsel %vm297_vm2, %v293_v5, 0.0  ;;  %v303_v20 = vsel %vm297_vm2, %v287_v3, 0.0 }
 0x200   :  { %v308_v28 = vpop.permute.xlu0 %307 }
 0x201   :  { %2217 = vmatmul.mubr.msk.f32.vlgmr.msra.gmra.mxu1 %vm179_vm0, %v308_v28 }
 0x202   :  { %604 = vmatpush1.msra.mxu1 %v2603_v11  ;;  %651 = vmatprep.mubr.f32.mxu1 %v2515_v4 }
 0x203   :  { %605 = vmatprep.subr.mxu1 %v2612_v13 }
 0x204   :  { %606 = vmatpush1.msra.mxu1 %v2617_v14 }
 0x205   :  { %607 = vmatprep.subr.mxu1 %v2626_v16 }
 0x206   :  { %608 = vmatpush1.msra.mxu1 %v2635_v18 }
 0x207   :  { %609 = vmatprep.subr.mxu1 %v2640_v19 }
 0x208   :  { %610 = vmatpush1.msra.mxu1 %v2649_v21 }
 0x209   :  { %611 = vmatprep.subr.mxu1 %v2658_v23 }
 0x20a   :  { %612 = vmatpush1.msra.mxu1 %v2667_v25 }
 0x20b   :  { %613 = vmatprep.subr.mxu1 %v2676_v27 }
 0x20c   :  { %614 = vmatpush1.msra.mxu1 %v2685_v29 }
 0x20d   :  { %615 = vmatprep.subr.mxu1 %v2694_v31 }
 0x20e   :  { %616 = vmatpush1.msra.mxu1 %v2703_v33 }
 0x20f   :  { %617 = vmatprep.subr.mxu1 %v2712_v35 }
 0x210   :  { %618 = vmatpush1.msra.mxu1 %v2721_v37 }
 0x211   :  { %872 = vmatprep.subr.mxu1 %v2594_v9 }
 0x2c1   :  { %v377_v30 = vpop.f32.mrf.mxu1 }
 0x2c2   :  { %v384_v32 = vrot.slane %v377_v30, 6 }
 0x2c3   :  { %v379_v38 = vpop.f32.mrf.mxu1 }
 0x2c4   :  { %v388_v34 = vadd.f32 %v384_v32, %v2811_v56  ;;  %v385_v39 = vrot.slane %v379_v38, 6  ;;  %v2918_v32 = vpop.f32.mrf.mxu0 }
 0x2c6   :  { %v2218_v36 = vmul.f32 -1.442695, %v388_v34  ;;  %v389_v40 = vadd.f32 %v385_v39, %v2821_v63  ;;  %v2920_v34 = vpop.f32.mrf.mxu0 }
 0x2c8   :  { %2361 = vpow2.f32 %v2218_v36  ;;  %v2219_v50 = vmul.f32 -1.442695, %v389_v40  ;;  %v2922_v36 = vpop.f32.mrf.mxu0 }
 0x2c9   :  { %2363 = vtanh.f32 %v389_v40 }
 0x2ca   :  { %v2924_v38 = vpop.f32.mrf.mxu0 }
 0x2d5   :  { %v2362_v41 = vpop.eup %2361 }
 0x2d6   :  { %v393_v42 = vadd.f32 1.0, %v2362_v41  ;;  %v2364_v43 = vpop.eup %2363 }
 0x2d8   :  { %2365 = vrcp.f32 %v393_v42 }
 0x2d9   :  { %2367 = vpow2.f32 %v2219_v50 }
 0x2e5   :  { %v2366_v45 = vpop.eup %2365 }
 0x2e6   :  { %v407_v46 = vmul.f32 %v2366_v45, %v2364_v43  ;;  %v406_v47 = vmul.f32 %v2366_v45, %v404_v44  ;;  %v2368_v53 = vpop.eup %2367 }
 0x2e7   :  { %v400_v55 = vadd.f32 1.0, %v2368_v53 }
 0x2e8   :  { %409 = vrot.lane.b32.xlu1 %v407_v46, %s2516_s3 }
 0x2e9   :  { %2369 = vrcp.f32 %v400_v55 }
 0x2f6   :  { %v2370_v62 = vpop.eup %2369 }
 0x35a   :  { %v410_v57 = vpop.permute.xlu1 %409 }
 0x35b   :  { %v2855_v58 = vadd.f32 %v410_v57, %v406_v47 }
 0x35d   :  { %2371 = vtanh.f32 %v2855_v58  ;;  %v542_v49 = vrot.slane %v2855_v58, 6 }
 0x36a   :  { %v2372_v2 = vpop.eup %2371 }
 0x36b   :  { %v414_v6 = vmul.f32 %v2372_v2, %v2370_v62 }
 0x36d   :  { %v444_v7 = vrot.slane %v414_v6, 2  ;;  %v424_v8 = vrot.slane %v414_v6, %v2862_v0  ;;  %v430_v10 = vrot.slane %v414_v6, %v2865_v1 }
 0x36f   :  { %445 = vrot.lane.b32.xlu1 %v444_v7, %s2516_s3  ;;  %v2886_v22 = vsel %vm415_vm3, %v424_v8, %v288_v12  ;;  %v2890_v24 = vsel %vm415_vm3, %v430_v10, %v294_v15  ;;  %v2894_v26 = vsel %vm434_vm4, %v430_v10, %v305_v17  ;;  %v2898_v28 = vsel %vm434_vm4, %v424_v8, %v303_v20 }
 0x370   :  { %v561_v7 = vsub.s32 4, %v2799_v51  ;;  %v567_v8 = vsub.s32 5, %v2799_v51  ;;  %v1492_v59 = vmul.f32 %v2898_v28, %v2898_v28 }
 0x3e1   :  { %v446_v30 = vpop.permute.xlu1 %445 }
 0x3e2   :  { %2220 = vmatmul.mubr.msk.f32.vlgmr.msra.gmra.mxu0 %vm179_vm0, %v446_v30 }
 0x3e3   :  { %742 = vmatpush1.msra.mxu0 %v2603_v11  ;;  %789 = vmatprep.mubr.f32.mxu0 %v2515_v4 }
 0x3e4   :  { %743 = vmatprep.subr.mxu0 %v2612_v13 }
 0x3e5   :  { %744 = vmatpush1.msra.mxu0 %v2617_v14 }
 0x3e6   :  { %745 = vmatprep.subr.mxu0 %v2626_v16 }
 0x3e7   :  { %746 = vmatpush1.msra.mxu0 %v2635_v18 }
 0x3e8   :  { %747 = vmatprep.subr.mxu0 %v2640_v19 }
 0x3e9   :  { %748 = vmatpush1.msra.mxu0 %v2649_v21 }
 0x3ea   :  { %749 = vmatprep.subr.mxu0 %v2658_v23 }
 0x3eb   :  { %750 = vmatpush1.msra.mxu0 %v2667_v25 }
 0x3ec   :  { %751 = vmatprep.subr.mxu0 %v2676_v27 }
 0x3ed   :  { %752 = vmatpush1.msra.mxu0 %v2685_v29 }
 0x3ee   :  { %753 = vmatprep.subr.mxu0 %v2694_v31 }
 0x3ef   :  { %754 = vmatpush1.msra.mxu0 %v2703_v33 }
 0x3f0   :  { %755 = vmatprep.subr.mxu0 %v2712_v35 }
 0x3f1   :  { %756 = vmatpush1.msra.mxu0 %v2721_v37 }
 0x3f2   :  { %998 = vmatprep.subr.mxu0 %v2594_v9 }
 0x4a2   :  { %v515_v39 = vpop.f32.mrf.mxu0 }
 0x4a3   :  { %v522_v40 = vrot.slane %v515_v39, 4 }
 0x4a4   :  { %v517_v43 = vpop.f32.mrf.mxu0 }
 0x4a5   :  { %v526_v41 = vadd.f32 %v522_v40, %v2811_v56  ;;  %v523_v44 = vrot.slane %v517_v43, 4 }
 0x4a7   :  { %v2221_v42 = vmul.f32 -1.442695, %v526_v41  ;;  %v527_v45 = vadd.f32 %v523_v44, %v2821_v63 }
 0x4a9   :  { %2373 = vpow2.f32 %v2221_v42  ;;  %v2222_v57 = vmul.f32 -1.442695, %v527_v45 }
 0x4aa   :  { %2375 = vtanh.f32 %v527_v45 }
 0x4b6   :  { %v2374_v46 = vpop.eup %2373 }
 0x4b7   :  { %v531_v47 = vadd.f32 1.0, %v2374_v46  ;;  %v2376_v48 = vpop.eup %2375 }
 0x4b9   :  { %2377 = vrcp.f32 %v531_v47 }
 0x4ba   :  { %2379 = vpow2.f32 %v2222_v57 }
 0x4c6   :  { %v2378_v50 = vpop.eup %2377 }
 0x4c7   :  { %v545_v53 = vmul.f32 %v2378_v50, %v2376_v48  ;;  %v544_v55 = vmul.f32 %v2378_v50, %v542_v49  ;;  %v2380_v62 = vpop.eup %2379 }
 0x4c8   :  { %v538_v2 = vadd.f32 1.0, %v2380_v62 }
 0x4c9   :  { %547 = vrot.lane.b32.xlu0 %v545_v53, %s2516_s3 }
 0x4ca   :  { %2381 = vrcp.f32 %v538_v2 }
 0x4d7   :  { %v2382_v6 = vpop.eup %2381 }
 0x53b   :  { %v548_v3 = vpop.permute.xlu0 %547 }
 0x53c   :  { %v550_v5 = vadd.f32 %v548_v3, %v544_v55  ;;  %v699_v3 = vsub.s32 6, %v2799_v51 }
 0x53e   :  { %2383 = vtanh.f32 %v550_v5  ;;  %v680_v48 = vrot.slane %v550_v5, 6 }
 0x54b   :  { %v2384_v10 = vpop.eup %2383 }
 0x54c   :  { %v552_v58 = vmul.f32 %v2384_v10, %v2382_v6  ;;  %v705_v6 = vsub.s32 7, %v2799_v51 }
 0x54e   :  { %v582_v12 = vrot.slane %v552_v58, 4  ;;  %v562_v15 = vrot.slane %v552_v58, %v561_v7  ;;  %v568_v17 = vrot.slane %v552_v58, %v567_v8 }
 0x550   :  { %583 = vrot.lane.b32.xlu1 %v582_v12, %s2516_s3  ;;  %v569_v20 = vsel %vm553_vm5, %v568_v17, %v2890_v24  ;;  %v2944_v30 = vsel %vm553_vm5, %v562_v15, %v2886_v22 }
 0x5c2   :  { %v584_v39 = vpop.permute.xlu1 %583 }
 0x5c3   :  { %2223 = vmatmul.mubr.msk.f32.vlgmr.msra.gmra.mxu1 %vm179_vm0, %v584_v39 }
 0x5c4   :  { %873 = vmatpush1.msra.mxu1 %v2603_v11  ;;  %920 = vmatprep.mubr.f32.mxu1 %v2515_v4 }
 0x5c5   :  { %874 = vmatprep.subr.mxu1 %v2612_v13 }
 0x5c6   :  { %875 = vmatpush1.msra.mxu1 %v2617_v14 }
 0x5c7   :  { %876 = vmatprep.subr.mxu1 %v2626_v16 }
 0x5c8   :  { %877 = vmatpush1.msra.mxu1 %v2635_v18 }
 0x5c9   :  { %878 = vmatprep.subr.mxu1 %v2640_v19 }
 0x5ca   :  { %879 = vmatpush1.msra.mxu1 %v2649_v21 }
 0x5cb   :  { %880 = vmatprep.subr.mxu1 %v2658_v23 }
 0x5cc   :  { %881 = vmatpush1.msra.mxu1 %v2667_v25 }
 0x5cd   :  { %882 = vmatprep.subr.mxu1 %v2676_v27 }
 0x5ce   :  { %883 = vmatpush1.msra.mxu1 %v2685_v29 }
 0x5cf   :  { %884 = vmatprep.subr.mxu1 %v2694_v31 }
 0x5d0   :  { %885 = vmatpush1.msra.mxu1 %v2703_v33 }
 0x5d1   :  { %886 = vmatprep.subr.mxu1 %v2712_v35 }
 0x5d2   :  { %887 = vmatpush1.msra.mxu1 %v2721_v37 }
 0x5d3   :  { %1124 = vmatprep.subr.mxu1 %v2594_v9 }
 0x683   :  { %v653_v22 = vpop.f32.mrf.mxu1 }
 0x684   :  { %v660_v24 = vrot.slane %v653_v22, 2  ;;  %v577_v22 = vsel %vm571_vm6, %v562_v15, 0.0  ;;  %v3010_v15 = vadd.f32 %v2918_v32, %v2808_v54 }
 0x685   :  { %v655_v42 = vpop.f32.mrf.mxu1 }
 0x686   :  { %v664_v40 = vadd.f32 %v660_v24, %v2811_v56  ;;  %v661_v43 = vrot.slane %v655_v42, 2  ;;  %v579_v24 = vsel %vm571_vm6, %v568_v17, 0.0 }
 0x688   :  { %v2224_v41 = vmul.f32 -1.442695, %v664_v40  ;;  %v665_v44 = vadd.f32 %v661_v43, %v2821_v63 }
 0x68a   :  { %2385 = vpow2.f32 %v2224_v41  ;;  %v2225_v55 = vmul.f32 -1.442695, %v665_v44 }
 0x68b   :  { %2387 = vtanh.f32 %v665_v44 }
 0x697   :  { %v2386_v45 = vpop.eup %2385 }
 0x698   :  { %v669_v46 = vadd.f32 1.0, %v2386_v45  ;;  %v2388_v47 = vpop.eup %2387 }
 0x69a   :  { %2389 = vrcp.f32 %v669_v46  ;;  %v3015_v46 = vadd.f32 %v2920_v34, %v2818_v61 }
 0x69b   :  { %2391 = vpow2.f32 %v2225_v55 }
 0x6a7   :  { %v2390_v49 = vpop.eup %2389 }
 0x6a8   :  { %v683_v50 = vmul.f32 %v2390_v49, %v2388_v47  ;;  %v682_v53 = vmul.f32 %v2390_v49, %v680_v48  ;;  %v2392_v56 = vpop.eup %2391 }
 0x6a9   :  { %v676_v57 = vadd.f32 1.0, %v2392_v56 }
 0x6aa   :  { %685 = vrot.lane.b32.xlu0 %v683_v50, %s2516_s3 }
 0x6ab   :  { %2393 = vrcp.f32 %v676_v57 }
 0x6b8   :  { %v2394_v63 = vpop.eup %2393 }
 0x71c   :  { %v686_v62 = vpop.permute.xlu0 %685 }
 0x71d   :  { %v688_v2 = vadd.f32 %v686_v62, %v682_v53 }
 0x71f   :  { %2395 = vtanh.f32 %v688_v2  ;;  %v812_v53 = vrot.slane %v688_v2, 6 }
 0x72c   :  { %v2396_v10 = vpop.eup %2395 }
 0x72d   :  { %v690_v5 = vmul.f32 %v2396_v10, %v2394_v63 }
 0x72f   :  { %v720_v58 = vrot.slane %v690_v5, 6  ;;  %v700_v12 = vrot.slane %v690_v5, %v699_v3  ;;  %v706_v39 = vrot.slane %v690_v5, %v705_v6 }
 0x731   :  { %721 = vrot.lane.b32.xlu1 %v720_v58, %s2516_s3  ;;  %v707_v40 = vsel %vm691_vm7, %v706_v39, %v569_v20  ;;  %v715_v41 = vsel %vm709_vm8, %v700_v12, %v577_v22  ;;  %v717_v42 = vsel %vm709_vm8, %v706_v39, %v579_v24  ;;  %v701_v43 = vsel %vm691_vm7, %v700_v12, %v2944_v30 }
 0x7a3   :  { %v722_v44 = vpop.permute.xlu1 %721 }
 0x7a4   :  { %2226 = vmatmul.mubr.msk.f32.vlgmr.msra.gmra.mxu0 %vm179_vm0, %v722_v44 }
 0x7a5   :  { %999 = vmatpush1.msra.mxu0 %v2603_v11  ;;  %1046 = vmatprep.mubr.f32.mxu0 %v2515_v4 }
 0x7a6   :  { %1000 = vmatprep.subr.mxu0 %v2612_v13 }
 0x7a7   :  { %1001 = vmatpush1.msra.mxu0 %v2617_v14 }
 0x7a8   :  { %1002 = vmatprep.subr.mxu0 %v2626_v16 }
 0x7a9   :  { %1003 = vmatpush1.msra.mxu0 %v2635_v18 }
 0x7aa   :  { %1004 = vmatprep.subr.mxu0 %v2640_v19 }
 0x7ab   :  { %1005 = vmatpush1.msra.mxu0 %v2649_v21 }
 0x7ac   :  { %1006 = vmatprep.subr.mxu0 %v2658_v23 }
 0x7ad   :  { %1007 = vmatpush1.msra.mxu0 %v2667_v25 }
 0x7ae   :  { %1008 = vmatprep.subr.mxu0 %v2676_v27 }
 0x7af   :  { %1009 = vmatpush1.msra.mxu0 %v2685_v29 }
 0x7b0   :  { %1010 = vmatprep.subr.mxu0 %v2694_v31 }
 0x7b1   :  { %1011 = vmatpush1.msra.mxu0 %v2703_v33 }
 0x7b2   :  { %1012 = vmatprep.subr.mxu0 %v2712_v35 }
 0x7b3   :  { %1013 = vmatpush1.msra.mxu0 %v2721_v37 }
 0x7b4   :  { %1250 = vmatprep.subr.mxu0 %v2594_v9 }
 0x864   :  { %v791_v17 = vpop.f32.mrf.mxu0 }
 0x865   :  { %v796_v20 = vadd.f32 %v791_v17, %v3010_v15 }
 0x866   :  { %v793_v45 = vpop.f32.mrf.mxu0 }
 0x867   :  { %v2227_v30 = vmul.f32 -1.442695, %v796_v20  ;;  %v797_v47 = vadd.f32 %v793_v45, %v3015_v46 }
 0x869   :  { %2397 = vpow2.f32 %v2227_v30  ;;  %v2228_v57 = vmul.f32 -1.442695, %v797_v47 }
 0x86a   :  { %2399 = vtanh.f32 %v797_v47 }
 0x876   :  { %v2398_v48 = vpop.eup %2397 }
 0x877   :  { %v801_v49 = vadd.f32 1.0, %v2398_v48  ;;  %v2400_v50 = vpop.eup %2399 }
 0x879   :  { %2401 = vrcp.f32 %v801_v49 }
 0x87a   :  { %2403 = vpow2.f32 %v2228_v57 }
 0x886   :  { %v2402_v32 = vpop.eup %2401 }
 0x887   :  { %v815_v55 = vmul.f32 %v2402_v32, %v2400_v50  ;;  %v814_v56 = vmul.f32 %v2402_v32, %v812_v53  ;;  %v2404_v62 = vpop.eup %2403 }
 0x888   :  { %v808_v63 = vadd.f32 1.0, %v2404_v62 }
 0x889   :  { %817 = vrot.lane.b32.xlu0 %v815_v55, %s2516_s3 }
 0x88a   :  { %2405 = vrcp.f32 %v808_v63 }
 0x897   :  { %v2406_v5 = vpop.eup %2405 }
 0x8fb   :  { %v818_v10 = vpop.permute.xlu0 %817 }
 0x8fc   :  { %v820_v34 = vadd.f32 %v818_v10, %v814_v56 }
 0x8fe   :  { %2407 = vtanh.f32 %v820_v34  ;;  %v949_v53 = vrot.slane %v820_v34, 6 }
 0x90b   :  { %v2408_v58 = vpop.eup %2407 }
 0x90c   :  { %v822_v12 = vmul.f32 %v2408_v58, %v2406_v5 }
 0x90e   :  { %852 = vrot.lane.b32.xlu1 %v822_v12, %s2516_s3  ;;  %v832_v2 = vrot.slane %v822_v12, %v2802_v52  ;;  %v838_v39 = vrot.slane %v822_v12, %v2815_v60 }
 0x910   :  { %v839_v22 = vsel %vm823_vm9, %v838_v39, %v707_v40  ;;  %v849_v24 = vsel %vm841_vm10, %v838_v39, %v717_v42  ;;  %v847_v44 = vsel %vm841_vm10, %v832_v2, %v715_v41  ;;  %v833_v17 = vsel %vm823_vm9, %v832_v2, %v701_v43 }
 0x980   :  { %v853_v20 = vpop.permute.xlu1 %852 }
 0x981   :  { %2229 = vmatmul.mubr.msk.f32.vlgmr.msra.gmra.mxu1 %vm179_vm0, %v853_v20 }
 0x982   :  { %1125 = vmatpush1.msra.mxu1 %v2603_v11  ;;  %1172 = vmatprep.mubr.f32.mxu1 %v2515_v4 }
 0x983   :  { %1126 = vmatprep.subr.mxu1 %v2612_v13 }
 0x984   :  { %1127 = vmatpush1.msra.mxu1 %v2617_v14 }
 0x985   :  { %1128 = vmatprep.subr.mxu1 %v2626_v16 }
 0x986   :  { %1129 = vmatpush1.msra.mxu1 %v2635_v18 }
 0x987   :  { %1130 = vmatprep.subr.mxu1 %v2640_v19 }
 0x988   :  { %1131 = vmatpush1.msra.mxu1 %v2649_v21 }
 0x989   :  { %1132 = vmatprep.subr.mxu1 %v2658_v23 }
 0x98a   :  { %1133 = vmatpush1.msra.mxu1 %v2667_v25 }
 0x98b   :  { %1134 = vmatprep.subr.mxu1 %v2676_v27 }
 0x98c   :  { %1135 = vmatpush1.msra.mxu1 %v2685_v29 }
 0x98d   :  { %1136 = vmatprep.subr.mxu1 %v2694_v31 }
 0x98e   :  { %1137 = vmatpush1.msra.mxu1 %v2703_v33 }
 0x98f   :  { %1138 = vmatprep.subr.mxu1 %v2712_v35 }
 0x990   :  { %1139 = vmatpush1.msra.mxu1 %v2721_v37 }
 0x991   :  { %1369 = vmatprep.subr.mxu1 %v2594_v9 }
 0xa41   :  { %v922_v40 = vpop.f32.mrf.mxu1 }
 0xa42   :  { %v929_v41 = vrot.slane %v922_v40, 6 }
 0xa43   :  { %v924_v30 = vpop.f32.mrf.mxu1 }
 0xa44   :  { %v933_v42 = vadd.f32 %v929_v41, %v3010_v15  ;;  %v930_v45 = vrot.slane %v924_v30, 6 }
 0xa46   :  { %v2230_v43 = vmul.f32 -1.442695, %v933_v42  ;;  %v934_v47 = vadd.f32 %v930_v45, %v3015_v46 }
 0xa48   :  { %2409 = vpow2.f32 %v2230_v43  ;;  %v2231_v9 = vmul.f32 -1.442695, %v934_v47 }
 0xa49   :  { %2411 = vtanh.f32 %v934_v47 }
 0xa55   :  { %v2410_v48 = vpop.eup %2409 }
 0xa56   :  { %v938_v49 = vadd.f32 1.0, %v2410_v48  ;;  %v2412_v50 = vpop.eup %2411 }
 0xa58   :  { %2413 = vrcp.f32 %v938_v49 }
 0xa59   :  { %2415 = vpow2.f32 %v2231_v9 }
 0xa65   :  { %v2414_v32 = vpop.eup %2413 }
 0xa66   :  { %v952_v55 = vmul.f32 %v2414_v32, %v2412_v50  ;;  %v951_v56 = vmul.f32 %v2414_v32, %v949_v53  ;;  %v2416_v57 = vpop.eup %2415 }
 0xa67   :  { %v945_v62 = vadd.f32 1.0, %v2416_v57 }
 0xa68   :  { %954 = vrot.lane.b32.xlu0 %v952_v55, %s2516_s3 }
 0xa69   :  { %2417 = vrcp.f32 %v945_v62 }
 0xa76   :  { %v2418_v5 = vpop.eup %2417 }
 0xada   :  { %v955_v63 = vpop.permute.xlu0 %954 }
 0xadb   :  { %v957_v10 = vadd.f32 %v955_v63, %v951_v56 }
 0xadd   :  { %2419 = vtanh.f32 %v957_v10 }
 0xaea   :  { %v2420_v58 = vpop.eup %2419 }
 0xaeb   :  { %v959_v12 = vmul.f32 %v2420_v58, %v2418_v5 }
 0xaed   :  { %v977_v2 = vrot.slane %v959_v12, 2  ;;  %v963_v39 = vrot.slane %v959_v12, %v2862_v0  ;;  %v969_v34 = vrot.slane %v959_v12, %v2865_v1  ;;  %v2486_v12 = vld [vmem:[%s3350_s2 + $0x68] sm:$0xff] }
 0xaef   :  { %978 = vrot.lane.b32.xlu1 %v977_v2, %s2516_s3  ;;  %v970_v20 = vsel %vm841_vm10, %v969_v34, %v839_v22  ;;  %v974_v40 = vsel %vm823_vm9, %v969_v34, %v849_v24  ;;  %v972_v41 = vsel %vm823_vm9, %v963_v39, %v847_v44  ;;  %v964_v42 = vsel %vm841_vm10, %v963_v39, %v833_v17  ;;  %v2487_v2 = vld [vmem:[%s3350_s2 + $0x60] sm:$0xff]  ;;  %v2488_v39 = vld [vmem:[%s3350_s2 + $0x58] sm:$0xff]  ;;  %v2489_v34 = vld [vmem:[%s3350_s2 + $0x50] sm:$0xff] }
 0xaf0   :  { %v1075_v44 = vrot.slane %v957_v10, 6 }
 0xb61   :  { %v979_v43 = vpop.permute.xlu1 %978 }
 0xb62   :  { %2232 = vmatmul.mubr.msk.f32.vlgmr.msra.gmra.mxu0 %vm179_vm0, %v979_v43 }
 0xb63   :  { %1251 = vmatpush1.msra.mxu0 %v2603_v11  ;;  %1298 = vmatprep.mubr.f32.mxu0 %v2515_v4 }
 0xb64   :  { %1252 = vmatprep.subr.mxu0 %v2612_v13 }
 0xb65   :  { %1253 = vmatpush1.msra.mxu0 %v2617_v14 }
 0xb66   :  { %1254 = vmatprep.subr.mxu0 %v2626_v16 }
 0xb67   :  { %1255 = vmatpush1.msra.mxu0 %v2635_v18 }
 0xb68   :  { %1256 = vmatprep.subr.mxu0 %v2640_v19 }
 0xb69   :  { %1257 = vmatpush1.msra.mxu0 %v2649_v21 }
 0xb6a   :  { %1258 = vmatprep.subr.mxu0 %v2658_v23 }
 0xb6b   :  { %1259 = vmatpush1.msra.mxu0 %v2667_v25 }
 0xb6c   :  { %1260 = vmatprep.subr.mxu0 %v2676_v27 }
 0xb6d   :  { %1261 = vmatpush1.msra.mxu0 %v2685_v29 }
 0xb6e   :  { %1262 = vmatprep.subr.mxu0 %v2694_v31 }
 0xb6f   :  { %1263 = vmatpush1.msra.mxu0 %v2703_v33 }
 0xb70   :  { %1264 = vmatprep.subr.mxu0 %v2712_v35 }
 0xb71   :  { %1265 = vmatpush1.msra.mxu0 %v2721_v37 }
 0xc22   :  { %v1048_v11 = vpop.f32.mrf.mxu0 }
 0xc23   :  { %v1055_v13 = vrot.slane %v1048_v11, 4 }
 0xc24   :  { %v1050_v18 = vpop.f32.mrf.mxu0 }
 0xc25   :  { %v1059_v14 = vadd.f32 %v1055_v13, %v3010_v15  ;;  %v1056_v19 = vrot.slane %v1050_v18, 4 }
 0xc27   :  { %v2233_v16 = vmul.f32 -1.442695, %v1059_v14  ;;  %v1060_v21 = vadd.f32 %v1056_v19, %v3015_v46 }
 0xc29   :  { %2421 = vpow2.f32 %v2233_v16  ;;  %v2234_v47 = vmul.f32 -1.442695, %v1060_v21 }
 0xc2a   :  { %2423 = vtanh.f32 %v1060_v21 }
 0xc36   :  { %v2422_v23 = vpop.eup %2421 }
 0xc37   :  { %v1064_v22 = vadd.f32 1.0, %v2422_v23  ;;  %v2424_v24 = vpop.eup %2423 }
 0xc39   :  { %2425 = vrcp.f32 %v1064_v22 }
 0xc3a   :  { %2427 = vpow2.f32 %v2234_v47 }
 0xc46   :  { %v2426_v17 = vpop.eup %2425 }
 0xc47   :  { %v1078_v30 = vmul.f32 %v2426_v17, %v2424_v24  ;;  %v1077_v45 = vmul.f32 %v2426_v17, %v1075_v44  ;;  %v2428_v48 = vpop.eup %2427 }
 0xc48   :  { %v1071_v49 = vadd.f32 1.0, %v2428_v48 }
 0xc49   :  { %1080 = vrot.lane.b32.xlu0 %v1078_v30, %s2516_s3 }
 0xc4a   :  { %2429 = vrcp.f32 %v1071_v49 }
 0xc57   :  { %v2430_v32 = vpop.eup %2429 }
 0xcbb   :  { %v1081_v50 = vpop.permute.xlu0 %1080 }
 0xcbc   :  { %v1083_v53 = vadd.f32 %v1081_v50, %v1077_v45  ;;  %v172_v50 = vadd.f32 %v2922_v36, %v2808_v54 }
 0xcbe   :  { %2431 = vtanh.f32 %v1083_v53 }
 0xccb   :  { %v2432_v55 = vpop.eup %2431 }
 0xccc   :  { %v1085_v56 = vmul.f32 %v2432_v55, %v2430_v32 }
 0xcce   :  { %v1103_v9 = vrot.slane %v1085_v56, 4  ;;  %v1089_v57 = vrot.slane %v1085_v56, %v561_v7  ;;  %v1095_v62 = vrot.slane %v1085_v56, %v567_v8  ;;  %v2485_v8 = vld [vmem:[%s3350_s2 + $0x70] sm:$0xff] }
 0xcd0   :  { %1104 = vrot.lane.b32.xlu1 %v1103_v9, %s2516_s3  ;;  %v3091_v63 = vsel %vm709_vm8, %v1095_v62, %v970_v20  ;;  %v3095_v10 = vsel %vm691_vm7, %v1095_v62, %v974_v40  ;;  %v3099_v5 = vsel %vm691_vm7, %v1089_v57, %v972_v41  ;;  %v3103_v7 = vsel %vm709_vm8, %v1089_v57, %v964_v42  ;;  %v2490_v20 = vld [vmem:[%s3350_s2 + $0x48] sm:$0xff]  ;;  %v2491_v40 = vld [vmem:[%s3350_s2 + $0x40] sm:$0xff]  ;;  %v2492_v41 = vld [vmem:[%s3350_s2 + $0x38] sm:$0xff]  ;;  %s2517_s2 = smov 32  }
 0xcd1   :  { %v174_v9 = vadd.f32 %v2924_v38, %v2818_v61 }
 0xd42   :  { %v1105_v58 = vpop.permute.xlu1 %1104 }
 0xd43   :  { %2235 = vmatmul.mubr.msk.f32.vlgmr.msra.gmra.mxu1 %vm179_vm0, %v1105_v58 }
 0xd44   :  { %1370 = vmatpush1.msra.mxu1 %v2485_v8  ;;  %1417 = vmatprep.mubr.f32.mxu1 %v2515_v4 }
 0xd45   :  { %1371 = vmatprep.subr.mxu1 %v2486_v12 }
 0xd46   :  { %1372 = vmatpush1.msra.mxu1 %v2487_v2 }
 0xd47   :  { %1373 = vmatprep.subr.mxu1 %v2488_v39 }
 0xd48   :  { %1374 = vmatpush1.msra.mxu1 %v2489_v34 }
 0xd49   :  { %1375 = vmatprep.subr.mxu1 %v2490_v20 }
 0xd4a   :  { %1376 = vmatpush1.msra.mxu1 %v2491_v40 }
 0xd4b   :  { %1377 = vmatprep.subr.mxu1 %v2492_v41 }
 0xd4c   :  { %1378 = vmatpush1.msra.mxu1 %v2667_v25 }
 0xd4d   :  { %1379 = vmatprep.subr.mxu1 %v2676_v27 }
 0xd4e   :  { %1380 = vmatpush1.msra.mxu1 %v2685_v29 }
 0xd4f   :  { %1381 = vmatprep.subr.mxu1 %v2694_v31 }
 0xd50   :  { %1382 = vmatpush1.msra.mxu1 %v2703_v33  ;;  %v1201_v33 = vrot.slane %v1083_v53, 6 }
 0xd51   :  { %1383 = vmatprep.subr.mxu1 %v2712_v35 }
 0xd52   :  { %1384 = vmatpush1.msra.mxu1 %v2721_v37 }
 0xe03   :  { %v1174_v42 = vpop.f32.mrf.mxu1 }
 0xe04   :  { %v1181_v43 = vrot.slane %v1174_v42, 2 }
 0xe05   :  { %v1176_v14 = vpop.f32.mrf.mxu1 }
 0xe06   :  { %v1185_v11 = vadd.f32 %v1181_v43, %v3010_v15  ;;  %v1182_v25 = vrot.slane %v1176_v14, 2 }
 0xe08   :  { %v2236_v13 = vmul.f32 -1.442695, %v1185_v11  ;;  %v1186_v27 = vadd.f32 %v1182_v25, %v3015_v46 }
 0xe0a   :  { %2433 = vpow2.f32 %v2236_v13  ;;  %v2237_v37 = vmul.f32 -1.442695, %v1186_v27 }
 0xe0b   :  { %2435 = vtanh.f32 %v1186_v27 }
 0xe17   :  { %v2434_v16 = vpop.eup %2433 }
 0xe18   :  { %v1190_v29 = vadd.f32 1.0, %v2434_v16  ;;  %v2436_v31 = vpop.eup %2435 }
 0xe1a   :  { %2437 = vrcp.f32 %v1190_v29 }
 0xe1b   :  { %2439 = vpow2.f32 %v2237_v37 }
 0xe27   :  { %v2438_v18 = vpop.eup %2437 }
 0xe28   :  { %v1204_v35 = vmul.f32 %v2438_v18, %v2436_v31  ;;  %v1203_v19 = vmul.f32 %v2438_v18, %v1201_v33  ;;  %v2440_v15 = vpop.eup %2439 }
 0xe29   :  { %v1197_v21 = vadd.f32 1.0, %v2440_v15  ;;  %v1542_v15 = vmul.f32 %v2894_v26, %v2894_v26 }
 0xe2a   :  { %1206 = vrot.lane.b32.xlu0 %v1204_v35, %s2516_s3 }
 0xe2b   :  { %2441 = vrcp.f32 %v1197_v21 }
 0xe38   :  { %v2442_v46 = vpop.eup %2441 }
 0xe9c   :  { %v1207_v23 = vpop.permute.xlu0 %1206 }
 0xe9d   :  { %v1209_v22 = vadd.f32 %v1207_v23, %v1203_v19 }
 0xe9f   :  { %2443 = vtanh.f32 %v1209_v22 }
 0xeac   :  { %v2444_v24 = vpop.eup %2443 }
 0xead   :  { %v1211_v44 = vmul.f32 %v2444_v24, %v2442_v46 }
 0xeaf   :  { %v1229_v17 = vrot.slane %v1211_v44, 6  ;;  %v1215_v30 = vrot.slane %v1211_v44, %v699_v3  ;;  %v1221_v45 = vrot.slane %v1211_v44, %v705_v6 }
 0xeb1   :  { %1230 = vrot.lane.b32.xlu1 %v1229_v17, %s2516_s3  ;;  %v3149_v47 = vsel %vm571_vm6, %v1221_v45, %v3091_v63  ;;  %v1226_v48 = vsel %vm553_vm5, %v1221_v45, %v3095_v10  ;;  %v1224_v49 = vsel %vm553_vm5, %v1215_v30, %v3099_v5  ;;  %v3160_v3 = vsel %vm571_vm6, %v1215_v30, %v3103_v7 }
 0xeb2   :  { %v1321_v5 = vrot.slane %v1209_v22, 6  ;;  %v1525_v41 = vmul.f32 %v3149_v47, %v3149_v47  ;;  %v1473_v51 = vmul.f32 %v3160_v3, %v3160_v3  ;;  %vm1777_vm5 = vcmask 80896  }
 0xeb3   :  { %vm1779_vm6 = vcmask 74752  }
 0xf23   :  { %v1231_v6 = vpop.permute.xlu1 %1230 }
 0xf24   :  { %2238 = vmatmul.mubr.msk.f32.vlgmr.msra.gmra.mxu0 %vm179_vm0, %v1231_v6 }
 0xfe4   :  { %v1300_v53 = vpop.f32.mrf.mxu0 }
 0xfe5   :  { %v1305_v32 = vadd.f32 %v1300_v53, %v172_v50 }
 0xfe6   :  { %v1302_v56 = vpop.f32.mrf.mxu0 }
 0xfe7   :  { %v2239_v55 = vmul.f32 -1.442695, %v1305_v32  ;;  %v1306_v57 = vadd.f32 %v1302_v56, %v174_v9 }
 0xfe9   :  { %2445 = vpow2.f32 %v2239_v55  ;;  %v2240_v54 = vmul.f32 -1.442695, %v1306_v57 }
 0xfea   :  { %2447 = vtanh.f32 %v1306_v57 }
 0xff6   :  { %v2446_v62 = vpop.eup %2445 }
 0xff7   :  { %v1310_v63 = vadd.f32 1.0, %v2446_v62  ;;  %v2448_v10 = vpop.eup %2447 }
 0xff9   :  { %2449 = vrcp.f32 %v1310_v63 }
 0xffa   :  { %2451 = vpow2.f32 %v2240_v54 }
0x1006   :  { %v2450_v7 = vpop.eup %2449 }
0x1007   :  { %v1324_v58 = vmul.f32 %v2450_v7, %v2448_v10  ;;  %v1323_v8 = vmul.f32 %v2450_v7, %v1321_v5  ;;  %v2452_v36 = vpop.eup %2451 }
0x1008   :  { %v1317_v12 = vadd.f32 1.0, %v2452_v36 }
0x1009   :  { %1326 = vrot.lane.b32.xlu0 %v1324_v58, %s2516_s3 }
0x100a   :  { %2453 = vrcp.f32 %v1317_v12 }
0x1017   :  { %v2454_v61 = vpop.eup %2453 }
0x107b   :  { %v1327_v2 = vpop.permute.xlu0 %1326 }
0x107c   :  { %v1329_v39 = vadd.f32 %v1327_v2, %v1323_v8 }
0x107e   :  { %2455 = vtanh.f32 %v1329_v39  ;;  %v1446_v18 = vrot.slane %v1329_v39, 6 }
0x108b   :  { %v2456_v38 = vpop.eup %2455 }
0x108c   :  { %v1331_v34 = vmul.f32 %v2456_v38, %v2454_v61 }
0x108e   :  { %1349 = vrot.lane.b32.xlu1 %v1331_v34, %s2516_s3  ;;  %v1335_v20 = vrot.slane %v1331_v34, %v2802_v52  ;;  %v1341_v40 = vrot.slane %v1331_v34, %v2815_v60 }
0x1090   :  { %v1346_v42 = vsel %vm415_vm3, %v1341_v40, %v1226_v48  ;;  %v1344_v43 = vsel %vm415_vm3, %v1335_v20, %v1224_v49  ;;  %v1343_v49 = vsel %vm434_vm4, %v1341_v40, 0.0  ;;  %v1337_v6 = vsel %vm434_vm4, %v1335_v20, 0.0 }
0x1092   :  { %1529 = vrot.lane.b32.xlu1 %v1525_v41, %s2516_s3 }
0x1100   :  { %v1350_v11 = vpop.permute.xlu1 %1349 }
0x1101   :  { %2241 = vmatmul.mubr.msk.f32.vlgmr.msra.gmra.mxu1 %vm179_vm0, %v1350_v11 }
0x1104   :  { %v1530_v63 = vpop.permute.xlu1 %1529 }
0x1105   :  { %v1535_v10 = vsel %vm1483_vm12, %v1530_v63, 0.0 }
0x11c1   :  { %v1419_v13 = vpop.f32.mrf.mxu1 }
0x11c2   :  { %v1426_v14 = vrot.slane %v1419_v13, 6 }
0x11c3   :  { %v1421_v60 = vpop.f32.mrf.mxu1 }
0x11c4   :  { %v1430_v25 = vadd.f32 %v1426_v14, %v172_v50  ;;  %v1427_v27 = vrot.slane %v1421_v60, 6 }
0x11c6   :  { %v2242_v52 = vmul.f32 -1.442695, %v1430_v25  ;;  %v1431_v16 = vadd.f32 %v1427_v27, %v174_v9 }
0x11c8   :  { %2457 = vpow2.f32 %v2242_v52  ;;  %v2243_v21 = vmul.f32 -1.442695, %v1431_v16 }
0x11c9   :  { %2459 = vtanh.f32 %v1431_v16 }
0x11d5   :  { %v2458_v29 = vpop.eup %2457 }
0x11d6   :  { %v1435_v31 = vadd.f32 1.0, %v2458_v29  ;;  %v2460_v33 = vpop.eup %2459 }
0x11d8   :  { %2461 = vrcp.f32 %v1435_v31 }
0x11d9   :  { %2463 = vpow2.f32 %v2243_v21 }
0x11e5   :  { %v2462_v35 = vpop.eup %2461 }
0x11e6   :  { %v1449_v19 = vmul.f32 %v2462_v35, %v2460_v33  ;;  %v1448_v37 = vmul.f32 %v2462_v35, %v1446_v18  ;;  %v2464_v23 = vpop.eup %2463 }
0x11e7   :  { %v1442_v22 = vadd.f32 1.0, %v2464_v23 }
0x11e8   :  { %1451 = vrot.lane.b32.xlu0 %v1449_v19, %s2516_s3 }
0x11e9   :  { %2465 = vrcp.f32 %v1442_v22 }
0x11ec   :  { %1547 = vrot.lane.b32.xlu0 %v1542_v15, %s2517_s2 }
0x11f6   :  { %v2466_v44 = vpop.eup %2465 }
0x125a   :  { %v1452_v46 = vpop.permute.xlu0 %1451 }
0x125b   :  { %v1454_v24 = vadd.f32 %v1452_v46, %v1448_v37 }
0x125d   :  { %2467 = vtanh.f32 %v1454_v24 }
0x125e   :  { %v1548_v57 = vpop.permute.xlu0 %1547 }
0x125f   :  { %v1554_v62 = vsel %vm1487_vm11, %v1548_v57, 0.0 }
0x126a   :  { %v2468_v17 = vpop.eup %2467 }
0x126b   :  { %v1456_v30 = vmul.f32 %v2468_v17, %v2466_v44 }
0x126d   :  { %v1466_v45 = vrot.slane %v1456_v30, %v2865_v1  ;;  %v1460_v48 = vrot.slane %v1456_v30, %v2862_v0 }
0x126f   :  { %v3191_v50 = vsel %vm278_vm1, %v1466_v45, %v1346_v42  ;;  %v3195_v53 = vsel %vm297_vm2, %v1466_v45, %v1343_v49  ;;  %v3199_v32 = vsel %vm278_vm1, %v1460_v48, %v1344_v43  ;;  %v3203_v0 = vsel %vm297_vm2, %v1460_v48, %v1337_v6 }
0x1270   :  { %v1541_v1 = vmul.f32 %v3191_v50, %v3191_v50  ;;  %v1526_v55 = vmul.f32 %v3195_v53, %v3195_v53  ;;  %v1491_v56 = vmul.f32 %v3199_v32, %v3199_v32  ;;  %v1474_v9 = vmul.f32 %v3203_v0, %v3203_v0 }
0x1272   :  { %1545 = vrot.lane.b32.xlu0 %v1541_v1, %s2517_s2  ;;  %1531 = vrot.lane.b32.xlu1 %v1526_v55, %s2516_s3 }
0x1276   :  { %1495 = vrot.lane.b32.xlu0 %v1491_v56, %s2517_s2  ;;  %1477 = vrot.lane.b32.xlu1 %v1473_v51, %s2516_s3 }
0x127a   :  { %1497 = vrot.lane.b32.xlu0 %v1492_v59, %s2517_s2  ;;  %1479 = vrot.lane.b32.xlu1 %v1474_v9, %s2516_s3 }
0x1299   :  { %1555 = vadd.xlane.f32.xlu0 %v1554_v62 }
0x129d   :  { %1536 = vadd.xlane.f32.xlu0 %v1535_v10 }
0x12e4   :  { %v1546_v5 = vpop.permute.xlu0 %1545  ;;  %v1532_v7 = vpop.permute.xlu1 %1531 }
0x12e5   :  { %v1538_v58 = vsel %vm1487_vm11, %v1532_v7, 0.0  ;;  %v1551_v36 = vsel %vm1483_vm12, %v1546_v5, 0.0 }
0x12e6   :  { %1539 = vadd.xlane.f32.xlu1 %v1538_v58 }
0x12e8   :  { %v1496_v8 = vpop.permute.xlu0 %1495  ;;  %v1478_v54 = vpop.permute.xlu1 %1477 }
0x12e9   :  { %v1484_v12 = vsel %vm1483_vm12, %v1478_v54, 0.0  ;;  %v1501_v39 = vsel %vm1483_vm12, %v1496_v8, 0.0 }
0x12ea   :  { %1552 = vadd.xlane.f32.xlu1 %v1551_v36  ;;  %1485 = vadd.xlane.f32.xlu0 %v1484_v12 }
0x12ec   :  { %v1480_v2 = vpop.permute.xlu1 %1479  ;;  %v1498_v38 = vpop.permute.xlu0 %1497 }
0x12ed   :  { %v1488_v61 = vsel %vm1487_vm11, %v1480_v2, 0.0  ;;  %v1504_v34 = vsel %vm1487_vm11, %v1498_v38, 0.0 }
0x12ee   :  { %1502 = vadd.xlane.f32.xlu1 %v1501_v39  ;;  %1489 = vadd.xlane.f32.xlu0 %v1488_v61 }
0x12f2   :  { %1505 = vadd.xlane.f32.xlu1 %v1504_v34 }
0x1322   :  { %v1556_v20 = vpop.xlane.xlu0 %1555 }
0x1326   :  { %v1537_v42 = vpop.xlane.xlu0 %1536 }
0x136f   :  { %v1540_v40 = vpop.xlane.xlu1 %1539 }
0x1370   :  { %v1558_v41 = vadd.f32 %v1556_v20, %v1540_v40 }
0x1372   :  { %2469 = vrsqrt.f32 %v1558_v41  ;;  %vm1568_vm13 = vcmp.eq.f32.partialorder %v1558_v41, inf  ;;  %v1571_v31 = vand.u32 2147483648, %v1558_v41  ;;  %vm1570_vm14 = vcmp.eq.f32.partialorder %v1558_v41, 0.0 }
0x1373   :  { %v1553_v43 = vpop.xlane.xlu1 %1552  ;;  %v1486_v13 = vpop.xlane.xlu0 %1485 }
0x1374   :  { %v1557_v11 = vadd.f32 %v1553_v43, %v1537_v42 }
0x1376   :  { %2471 = vrsqrt.f32 %v1557_v11  ;;  %vm1561_vm15 = vcmp.eq.f32.partialorder %v1557_v11, inf  ;;  %v1564_v15 = vand.u32 2147483648, %v1557_v11  ;;  %vm1563_vm0 = vcmp.eq.f32.partialorder %v1557_v11, 0.0 }
0x1377   :  { %v1503_v14 = vpop.xlane.xlu1 %1502  ;;  %v1490_v52 = vpop.xlane.xlu0 %1489 }
0x1378   :  { %v1507_v25 = vadd.f32 %v1503_v14, %v1486_v13 }
0x137a   :  { %2473 = vrsqrt.f32 %v1507_v25  ;;  %vm1511_vm1 = vcmp.eq.f32.partialorder %v1507_v25, inf  ;;  %v1514_v44 = vand.u32 2147483648, %v1507_v25  ;;  %vm1513_vm2 = vcmp.eq.f32.partialorder %v1507_v25, 0.0 }
0x137b   :  { %v1506_v60 = vpop.xlane.xlu1 %1505 }
0x137c   :  { %v1508_v27 = vadd.f32 %v1506_v60, %v1490_v52 }
0x137e   :  { %2475 = vrsqrt.f32 %v1508_v27  ;;  %vm1518_vm3 = vcmp.eq.f32.partialorder %v1508_v27, inf  ;;  %v1521_v6 = vand.u32 2147483648, %v1508_v27  ;;  %vm1520_vm4 = vcmp.eq.f32.partialorder %v1508_v27, 0.0 }
0x137f   :  { %v2470_v16 = vpop.eup %2469 }
0x1380   :  { %v1567_v29 = vmul.f32 %v2470_v16, %v1558_v41 }
0x1382   :  { %v1569_v33 = vsel %vm1568_vm13, %v1558_v41, %v1567_v29 }
0x1383   :  { %v2472_v18 = vpop.eup %2471  ;;  %v1572_v35 = vsel %vm1570_vm14, %v1571_v31, %v1569_v33 }
0x1384   :  { %v1560_v19 = vmul.f32 %v2472_v18, %v1557_v11  ;;  %v1574_v37 = vmax.f32 %v1572_v35, 1e-12 }
0x1386   :  { %v1562_v21 = vsel %vm1561_vm15, %v1557_v11, %v1560_v19  ;;  %2477 = vrcp.f32 %v1574_v37  ;;  %vm1880_vm15 = vcmask 1041408  }
0x1387   :  { %v2474_v23 = vpop.eup %2473  ;;  %v1565_v22 = vsel %vm1563_vm0, %v1564_v15, %v1562_v21 }
0x1388   :  { %v1510_v46 = vmul.f32 %v2474_v23, %v1507_v25  ;;  %v1573_v24 = vmax.f32 %v1565_v22, 1e-12 }
0x138a   :  { %v1512_v17 = vsel %vm1511_vm1, %v1507_v25, %v1510_v46  ;;  %2479 = vrcp.f32 %v1573_v24 }
0x138b   :  { %v2476_v30 = vpop.eup %2475  ;;  %v1515_v45 = vsel %vm1513_vm2, %v1514_v44, %v1512_v17 }
0x138c   :  { %v1517_v48 = vmul.f32 %v2476_v30, %v1508_v27  ;;  %v1523_v49 = vmax.f32 %v1515_v45, 1e-12 }
0x138e   :  { %v1519_v1 = vsel %vm1518_vm3, %v1508_v27, %v1517_v48  ;;  %2481 = vrcp.f32 %v1523_v49 }
0x138f   :  { %v1522_v55 = vsel %vm1520_vm4, %v1521_v6, %v1519_v1 }
0x1390   :  { %v1524_v56 = vmax.f32 %v1522_v55, 1e-12 }
0x1392   :  { %2483 = vrcp.f32 %v1524_v56 }
0x1393   :  { %v2478_v51 = vpop.eup %2477 }
0x1394   :  { %v1586_v59 = vmul.f32 %v2478_v51, %v2894_v26  ;;  %v1584_v9 = vmul.f32 %v2478_v51, %v3195_v53 }
0x1396   :  { %1597 = vrot.lane.b32.xlu0 %v1586_v59, %s2517_s2  ;;  %1692 = vrot.lane.b32.xlu1 %v1584_v9, %s2516_s3 }
0x1397   :  { %v2480_v57 = vpop.eup %2479 }
0x1398   :  { %v1585_v62 = vmul.f32 %v2480_v57, %v3191_v50  ;;  %v1582_v63 = vmul.f32 %v2480_v57, %v3149_v47 }
0x139a   :  { %1595 = vrot.lane.b32.xlu1 %v1585_v62, %s2517_s2  ;;  %1690 = vrot.lane.b32.xlu0 %v1582_v63, %s2516_s3 }
0x139b   :  { %v2482_v10 = vpop.eup %2481 }
0x139c   :  { %v1579_v5 = vmul.f32 %v2482_v10, %v3199_v32  ;;  %v1576_v26 = vmul.f32 %v2482_v10, %v3160_v3 }
0x139e   :  { %1589 = vrot.lane.b32.xlu1 %v1579_v5, %s2517_s2  ;;  %1684 = vrot.lane.b32.xlu0 %v1576_v26, %s2516_s3 }
0x139f   :  { %v2484_v53 = vpop.eup %2483 }
0x13a0   :  { %v1580_v7 = vmul.f32 %v2484_v53, %v2898_v28  ;;  %v1578_v50 = vmul.f32 %v2484_v53, %v3203_v0 }
0x13a2   :  { %1591 = vrot.lane.b32.xlu1 %v1580_v7, %s2517_s2  ;;  %1686 = vrot.lane.b32.xlu0 %v1578_v50, %s2516_s3 }
0x1408   :  { %v1598_v47 = vpop.permute.xlu0 %1597  ;;  %v1693_v58 = vpop.permute.xlu1 %1692 }
0x1409   :  { %2294 = vmatprep.subr.msk.mxu0 %vm1483_vm12, %v1598_v47  ;;  %2301 = vmatprep.subr.msk.mxu1 %vm1483_vm12, %v1693_v58 }
0x140a   :  { %2295 = vmatpush3.xpose.msk.msra.mxu0 %vm1483_vm12, %v1598_v47  ;;  %2302 = vmatpush3.xpose.msk.msra.mxu1 %vm1483_vm12, %v1693_v58 }
0x140c   :  { %v1691_v3 = vpop.permute.xlu0 %1690  ;;  %v1596_v32 = vpop.permute.xlu1 %1595 }
0x140d   :  { %2296 = vmatprep.subr.msk.mxu0 %vm1483_vm12, %v1596_v32  ;;  %2303 = vmatprep.subr.msk.mxu1 %vm1483_vm12, %v1691_v3 }
0x140e   :  { %2297 = vmatpush3.xpose.msk.msra.mxu0 %vm1483_vm12, %v1596_v32  ;;  %2304 = vmatpush3.xpose.msk.msra.mxu1 %vm1483_vm12, %v1691_v3 }
0x1410   :  { %v1685_v28 = vpop.permute.xlu0 %1684  ;;  %v1590_v0 = vpop.permute.xlu1 %1589 }
0x1411   :  { %2298 = vmatprep.mubr.msk.f32.mxu0 %vm1483_vm12, %v1590_v0  ;;  %2305 = vmatprep.mubr.msk.f32.mxu1 %vm1483_vm12, %v1685_v28 }
0x1414   :  { %v1687_v8 = vpop.permute.xlu0 %1686  ;;  %v1592_v54 = vpop.permute.xlu1 %1591 }
0x1415   :  { %2299 = vmatmul.mubr.msk.f32.vlgmr.msra.gmra.mxu0 %vm1483_vm12, %v1592_v54  ;;  %2306 = vmatmul.mubr.msk.f32.vlgmr.msra.gmra.mxu1 %vm1483_vm12, %v1687_v8  ;;  %v1960_v8 = vld [vmem:[%s3353_s5 + $0x8] sm:$0x3]  ;;  %v1959_v54 = vld [vmem:[%s3353_s5] sm:$0xff] }
0x1416   :  { %2315 = vmatprep.subr.msk.mxu1 %vm1880_vm15, %v1960_v8 }
0x1417   :  { %2316 = vmatpush3.msk.msra.mxu1 %vm1880_vm15, %v1960_v8 }
0x1418   :  { %2317 = vmatprep.subr.mxu1 %v1959_v54 }
0x1419   :  { %2318 = vmatpush3.msra.mxu1 %v1959_v54 }
0x14d5   :  { %v2300_v36 = vpop.f32.mrf.mxu0  ;;  %v2307_v12 = vpop.f32.mrf.mxu1 }
0x14d6   :  { %v3259_v2 = vadd.f32 %v2307_v12, %v2300_v36 }
0x14d7   :  { %v1673_v39 = vpop.f32.mrf.mxu0  ;;  %v1768_v61 = vpop.f32.mrf.mxu1 }
0x14d8   :  { %v3261_v38 = vadd.f32 %v1768_v61, %v1673_v39  ;;  %v1780_v20 = vsel %vm1779_vm6, %v3259_v2, -inf }
0x14da   :  { %v1778_v34 = vsel %vm1777_vm5, %v3261_v38, -inf }
0x14db   :  { %v1781_v40 = vmax.f32 %v1778_v34, %v1780_v20 }
0x14dd   :  { %1782 = vmax.xlane.f32.xlu1 %v1781_v40 }
0x1566   :  { %v1783_v41 = vpop.xlane.xlu1 %1782 }
0x1567   :  { %v1784_v42 = vrot.slane %v1783_v41, 4 }
0x1569   :  { %v1785_v43 = vmax.f32 %v1783_v41, %v1784_v42 }
0x156b   :  { %v1786_v11 = vrot.slane %v1785_v43, 2 }
0x156d   :  { %v1787_v13 = vmax.f32 %v1785_v43, %v1786_v11 }
0x156f   :  { %v1788_v14 = vrot.slane %v1787_v13, 1 }
0x1571   :  { %v1789_v25 = vmax.f32 %v1787_v13, %v1788_v14  ;;  %v1872_v14 = vld [vmem:[%s3352_s4] sm:$0xff] }
0x1572   :  { %2312 = vmatprep.mubr.msk.f32.mxu0 %vm1777_vm5, %v1872_v14 }
0x1573   :  { %2322 = vpush %v1789_v25  ;;  %v2518_v25 = vmov 0  }
0x1574   :  { %2348 = vset.pattern.permute.xlu0 %v2518_v25  ;;  %2347 = vset.pattern.permute.xlu1 %v2518_v25 }
0x15a4   :  { %s2323_s13 = spop %2322 }
0x15a5   :  { %v1791_v52 = vstv %s2323_s13 }
0x15a6   :  { %vm1792_vm7 = vcmp.ge.f32.partialorder %v3261_v38, %v1791_v52  ;;  %vm1793_vm8 = vcmp.ge.f32.partialorder %v3259_v2, %v1791_v52 }
0x15a7   :  { %v1794_v60 = vsel %vm1792_vm7, -inf, %v3261_v38  ;;  %v1795_v27 = vsel %vm1793_vm8, -inf, %v3259_v2 }
0x15a8   :  { %v1796_v16 = vsel %vm1777_vm5, %v1794_v60, -inf  ;;  %v1797_v29 = vsel %vm1779_vm6, %v1795_v27, -inf }
0x15a9   :  { %v1798_v31 = vmax.f32 %v1796_v16, %v1797_v29 }
0x15ab   :  { %1799 = vmax.xlane.f32.xlu0 %v1798_v31 }
0x1634   :  { %v1800_v33 = vpop.xlane.xlu0 %1799 }
0x1635   :  { %v1801_v18 = vrot.slane %v1800_v33, 4 }
0x1637   :  { %v1802_v35 = vmax.f32 %v1800_v33, %v1801_v18 }
0x1639   :  { %v1803_v19 = vrot.slane %v1802_v35, 2 }
0x163b   :  { %v1804_v37 = vmax.f32 %v1802_v35, %v1803_v19 }
0x163d   :  { %v1805_v15 = vrot.slane %v1804_v37, 1 }
0x163f   :  { %v1806_v21 = vmax.f32 %v1804_v37, %v1805_v15 }
0x1641   :  { %2324 = vpush %v1806_v21 }
0x1672   :  { %s2325_s14 = spop %2324 }
0x1673   :  { %v1808_v23 = vstv %s2325_s14 }
0x1674   :  { %vm1809_vm9 = vcmp.ge.f32.partialorder %v1794_v60, %v1808_v23  ;;  %vm1810_vm10 = vcmp.ge.f32.partialorder %v1795_v27, %v1808_v23 }
0x1675   :  { %v1811_v22 = vsel %vm1809_vm9, -inf, %v1794_v60  ;;  %v1812_v46 = vsel %vm1810_vm10, -inf, %v1795_v27  ;;  %v1873_v27 = vld [vmem:[%s3352_s4 + $0x8] sm:$0x3] }
0x1676   :  { %v1813_v24 = vsel %vm1777_vm5, %v1811_v22, -inf  ;;  %v1814_v44 = vsel %vm1779_vm6, %v1812_v46, -inf }
0x1677   :  { %v1815_v17 = vmax.f32 %v1813_v24, %v1814_v44 }
0x1679   :  { %1816 = vmax.xlane.f32.xlu0 %v1815_v17 }
0x1702   :  { %v1817_v30 = vpop.xlane.xlu0 %1816 }
0x1703   :  { %v1818_v45 = vrot.slane %v1817_v30, 4 }
0x1705   :  { %v1819_v48 = vmax.f32 %v1817_v30, %v1818_v45 }
0x1707   :  { %v1820_v49 = vrot.slane %v1819_v48, 2 }
0x1709   :  { %v1821_v6 = vmax.f32 %v1819_v48, %v1820_v49 }
0x170b   :  { %v1822_v1 = vrot.slane %v1821_v6, 1 }
0x170d   :  { %v1823_v55 = vmax.f32 %v1821_v6, %v1822_v1 }
0x170f   :  { %2326 = vpush %v1823_v55 }
0x1740   :  { %s2327_s1 = spop %2326 }
0x1741   :  { %v1825_v56 = vstv %s2327_s1  ;;  %s2519_s1 = smov [#allocation2]  }
0x1742   :  { %vm1826_vm11 = vcmp.ge.f32.partialorder %v1811_v22, %v1825_v56  ;;  %vm1827_vm12 = vcmp.ge.f32.partialorder %v1812_v46, %v1825_v56 }
0x1743   :  { %v1828_v51 = vsel %vm1826_vm11, -inf, %v1811_v22  ;;  %v1829_v59 = vsel %vm1827_vm12, -inf, %v1812_v46 }
0x1744   :  { %v1830_v9 = vsel %vm1777_vm5, %v1828_v51, -inf  ;;  %v1831_v57 = vsel %vm1779_vm6, %v1829_v59, -inf }
0x1745   :  { %v1832_v62 = vmax.f32 %v1830_v9, %v1831_v57 }
0x1747   :  { %1833 = vmax.xlane.f32.xlu1 %v1832_v62 }
0x17d0   :  { %v1834_v63 = vpop.xlane.xlu1 %1833 }
0x17d1   :  { %v1835_v10 = vrot.slane %v1834_v63, 4 }
0x17d3   :  { %v1836_v5 = vmax.f32 %v1834_v63, %v1835_v10 }
0x17d5   :  { %v1837_v26 = vrot.slane %v1836_v5, 2 }
0x17d7   :  { %v1838_v53 = vmax.f32 %v1836_v5, %v1837_v26 }
0x17d9   :  { %v1839_v7 = vrot.slane %v1838_v53, 1 }
0x17db   :  { %v1840_v50 = vmax.f32 %v1838_v53, %v1839_v7 }
0x17dd   :  { %2328 = vpush %v1840_v50 }
0x180e   :  { %s2329_s15 = spop %2328 }
0x180f   :  { %v1842_v47 = vstv %s2329_s15  ;;  %s2207_s15 = sshll.u32 %s2519_s1, 4  ;;  %s2208_s15 = int_to_ptr.vmem [resolvable:$true] %s2207_s15 }
0x1810   :  { %vm1843_vm13 = vcmp.ge.f32.partialorder %v1828_v51, %v1842_v47  ;;  %vm1844_vm14 = vcmp.ge.f32.partialorder %v1829_v59, %v1842_v47  ;;  %s2493_s3 = scalar_lea.vmem %s2208_s15, 16  ;;  %s2497_s16 = scalar_lea.vmem %s2208_s15, 32 }
0x1811   :  { %v1845_v58 = vsel %vm1843_vm13, -inf, %v1828_v51  ;;  %v1846_v3 = vsel %vm1844_vm14, -inf, %v1829_v59  ;;  %p2494_p0 = scmp.ne.s32.totalorder %s2208_s15, %s2493_s3  ;;  %p2498_p1 = scmp.lt.s32.totalorder %s2208_s15, %s2208_s15 }
0x1812   :  { %v1847_v32 = vsel %vm1777_vm5, %v1845_v58, -inf  ;;  %v1848_v28 = vsel %vm1779_vm6, %v1846_v3, -inf  ;;  %p2499_p2 = scmp.lt.s32.totalorder %s2497_s16, %s2493_s3 }
0x1813   :  { %v1849_v0 = vmax.f32 %v1847_v32, %v1848_v28 }
0x1814   :  { %p2500_p3 = por %p2499_p2, %p2498_p1 }
0x1815   :  { %1850 = vmax.xlane.f32.xlu0 %v1849_v0 }
0x1816   :  { %p2501_p4 = pnand %p2500_p3, %p2494_p0 }
0x189e   :  { %v1851_v36 = vpop.xlane.xlu0 %1850 }
0x189f   :  { %v1852_v12 = vrot.slane %v1851_v36, 4 }
0x18a1   :  { %v1853_v39 = vmax.f32 %v1851_v36, %v1852_v12 }
0x18a3   :  { %v1854_v61 = vrot.slane %v1853_v39, 2 }
0x18a5   :  { %v1855_v34 = vmax.f32 %v1853_v39, %v1854_v61 }
0x18a7   :  { %v1856_v20 = vrot.slane %v1855_v34, 1 }
0x18a9   :  { %v1857_v40 = vmax.f32 %v1855_v34, %v1856_v20 }
0x18ab   :  { %2330 = vpush %v1857_v40 }
0x18dc   :  { %s2331_s19 = spop %2330 }
0x18dd   :  { %v1859_v41 = vstv %s2331_s19 }
0x18de   :  { %vm1860_vm0 = vcmp.ge.f32.partialorder %v3261_v38, %v1859_v41  ;;  %vm1861_vm1 = vcmp.ge.f32.partialorder %v3259_v2, %v1859_v41 }
0x18df   :  { %v2252_v42 = vsel %vm1860_vm0, 1.0, %v2515_v4  ;;  %v2253_v43 = vsel %vm1861_vm1, 1.0, %v2515_v4 }
0x18e0   :  { %2319 = vmatprep.mubr.msk.f32.mxu1 %vm1777_vm5, %v2252_v42  ;;  %v1869_v11 = vsel %vm1779_vm6, %v2253_v43, 0.0  ;;  %v1866_v13 = vsel %vm1777_vm5, %v2252_v42, 0.0  ;;  %v2057_v22 = vmul.f32 %v2252_v42, %v3261_v38  ;;  %v2058_v46 = vmul.f32 %v2253_v43, %v3259_v2 }
0x18e1   :  { %1870 = vadd.xlane.f32.xlu1 %v1869_v11  ;;  %2320 = vmatmul.mubr.msk.f32.vlgmr.msra.gmra.mxu1 %vm1777_vm5, %v2253_v43 }
0x18e2   :  { %1867 = vadd.xlane.f32.xlu0 %v1866_v13 }
0x196a   :  { %v1871_v52 = vpop.xlane.xlu1 %1870 }
0x196b   :  { %2308 = vmatprep.subr.msk.mxu0 %vm1880_vm15, %v1871_v52  ;;  %v1868_v60 = vpop.xlane.xlu0 %1867 }
0x196c   :  { %2309 = vmatpush3.msk.msra.mxu0 %vm1880_vm15, %v1871_v52 }
0x196d   :  { %2310 = vmatprep.subr.mxu0 %v1868_v60 }
0x196e   :  { %2311 = vmatpush3.msra.mxu0 %v1868_v60 }
0x196f   :  { %2313 = vmatmul.mubr.msk.f32.vlgmr.msra.gmra.mxu0 %vm1777_vm5, %v1873_v27 }
0x19a1   :  { %v2321_v31 = vpop.f32.mrf.mxu1 }
0x19a3   :  { %v2036_v35 = vpop.f32.mrf.mxu1 }
0x1a2f   :  { %v2314_v16 = vpop.f32.mrf.mxu0 }
0x1a30   :  { %2052 = vperm.xlu0 %2348, %v2314_v16  }
0x1a31   :  { %v1950_v29 = vpop.f32.mrf.mxu0 }
0x1a32   :  { %2047 = vperm.xlu1 %2347, %v1950_v29  }
0x1aab   :  { %v2053_v33 = vpop.permute.xlu0 %2052 }
0x1aac   :  { %v2056_v18 = vadd.f32 %v2321_v31, %v2053_v33 }
0x1aad   :  { %v2048_v19 = vpop.permute.xlu1 %2047 }
0x1aae   :  { %v2055_v37 = vadd.f32 %v2048_v19, %v2036_v35  ;;  %v2060_v15 = vand.u32 2147483647, %v2056_v18  ;;  %v2263_v21 = vadd.f32 -1.0, %v2056_v18  ;;  %v2267_v23 = vadd.f32 -2.0, %v2056_v18 }
0x1aaf   :  { %v2271_v24 = vadd.f32 -3.0, %v2056_v18  ;;  %v2275_v44 = vadd.f32 -4.0, %v2056_v18 }
0x1ab0   :  { %v2059_v17 = vand.u32 2147483647, %v2055_v37  ;;  %vm2062_vm2 = vcmp.lt.f32.partialorder %v2060_v15, 0.5  ;;  %v2262_v30 = vadd.f32 -1.0, %v2055_v37  ;;  %v2088_v45 = vand.u32 2147483647, %v2263_v21 }
0x1ab1   :  { %v2261_v48 = vsel %vm2062_vm2, 1.0, %v2515_v4  ;;  %v2266_v49 = vadd.f32 -2.0, %v2055_v37  ;;  %v2116_v6 = vand.u32 2147483647, %v2267_v23  ;;  %v2270_v1 = vadd.f32 -3.0, %v2055_v37 }
0x1ab2   :  { %vm2061_vm3 = vcmp.lt.f32.partialorder %v2059_v17, 0.5  ;;  %v2068_v55 = vmul.f32 %v2261_v48, %v2058_v46  ;;  %v2087_v56 = vand.u32 2147483647, %v2262_v30  ;;  %vm2090_vm4 = vcmp.lt.f32.partialorder %v2088_v45, 0.5 }
0x1ab3   :  { %v2260_v51 = vsel %vm2061_vm3, 1.0, %v2515_v4  ;;  %v2265_v38 = vsel %vm2090_vm4, 1.0, %v2515_v4  ;;  %v2115_v2 = vand.u32 2147483647, %v2266_v49  ;;  %vm2118_vm7 = vcmp.lt.f32.partialorder %v2116_v6, 0.5 }
0x1ab4   :  { %v2067_v59 = vmul.f32 %v2260_v51, %v2057_v22  ;;  %v2070_v9 = vsel %vm1779_vm6, %v2068_v55, 0.0  ;;  %vm2089_vm8 = vcmp.lt.f32.partialorder %v2087_v56, 0.5  ;;  %v2096_v57 = vmul.f32 %v2265_v38, %v2058_v46 }
0x1ab5   :  { %v2264_v62 = vsel %vm2089_vm8, 1.0, %v2515_v4  ;;  %vm2117_vm9 = vcmp.lt.f32.partialorder %v2115_v2, 0.5  ;;  %v2269_v63 = vsel %vm2118_vm7, 1.0, %v2515_v4  ;;  %v2143_v10 = vand.u32 2147483647, %v2270_v1 }
0x1ab6   :  { %v2069_v5 = vsel %vm1777_vm5, %v2067_v59, 0.0  ;;  %v2095_v26 = vmul.f32 %v2264_v62, %v2057_v22  ;;  %v2098_v53 = vsel %vm1779_vm6, %v2096_v57, 0.0  ;;  %v2268_v7 = vsel %vm2117_vm9, 1.0, %v2515_v4 }
0x1ab7   :  { %v2071_v50 = vadd.f32 %v2070_v9, %v2069_v5  ;;  %v2123_v47 = vmul.f32 %v2268_v7, %v2057_v22  ;;  %v2124_v58 = vmul.f32 %v2269_v63, %v2058_v46  ;;  %v2144_v3 = vand.u32 2147483647, %v2271_v24 }
0x1ab8   :  { %v2097_v32 = vsel %vm1777_vm5, %v2095_v26, 0.0  ;;  %vm2145_vm10 = vcmp.lt.f32.partialorder %v2143_v10, 0.5  ;;  %v2274_v28 = vadd.f32 -4.0, %v2055_v37  ;;  %v2172_v0 = vand.u32 2147483647, %v2275_v44 }
0x1ab9   :  { %2072 = vadd.xlane.f32.xlu1 %v2071_v50  ;;  %v2099_v8 = vadd.f32 %v2098_v53, %v2097_v32  ;;  %v2125_v54 = vsel %vm1777_vm5, %v2123_v47, 0.0  ;;  %v2126_v36 = vsel %vm1779_vm6, %v2124_v58, 0.0  ;;  %vm2146_vm11 = vcmp.lt.f32.partialorder %v2144_v3, 0.5  ;;  %v2109_v26 = vld [vmem:[%s3354_s6 + $0x1] sm:$0x1] }
0x1aba   :  { %v2127_v12 = vadd.f32 %v2126_v36, %v2125_v54  ;;  %v2272_v39 = vsel %vm2145_vm10, 1.0, %v2515_v4  ;;  %v2273_v61 = vsel %vm2146_vm11, 1.0, %v2515_v4  ;;  %v2171_v34 = vand.u32 2147483647, %v2274_v28  ;;  %v2081_v53 = vld [vmem:[%s3354_s6] sm:$0x1] }
0x1abb   :  { %2100 = vadd.xlane.f32.xlu0 %v2099_v8  ;;  %v2151_v20 = vmul.f32 %v2272_v39, %v2057_v22  ;;  %v2152_v40 = vmul.f32 %v2273_v61, %v2058_v46  ;;  %vm2174_vm12 = vcmp.lt.f32.partialorder %v2172_v0, 0.5  ;;  %v2137_v58 = vld [vmem:[%s3354_s6 + $0x2] sm:$0x1]  ;;  %v2165_v28 = vld [vmem:[%s3354_s6 + $0x3] sm:$0x1] }
0x1abc   :  { %vm2173_vm13 = vcmp.lt.f32.partialorder %v2171_v34, 0.5  ;;  %v2277_v41 = vsel %vm2174_vm12, 1.0, %v2515_v4 }
0x1abd   :  { %2128 = vadd.xlane.f32.xlu1 %v2127_v12  ;;  %v2153_v42 = vsel %vm1777_vm5, %v2151_v20, 0.0  ;;  %v2154_v43 = vsel %vm1779_vm6, %v2152_v40, 0.0  ;;  %v2276_v11 = vsel %vm2173_vm13, 1.0, %v2515_v4  ;;  %v2180_v13 = vmul.f32 %v2277_v41, %v2058_v46  ;;  %v2193_v12 = vld [vmem:[%s3354_s6 + $0x4] sm:$0x1] }
0x1abe   :  { %v2155_v14 = vadd.f32 %v2154_v43, %v2153_v42  ;;  %v2179_v25 = vmul.f32 %v2276_v11, %v2057_v22  ;;  %v2197_v40 = vld [vmem:[%s3355_s7] sm:$0x1] }
0x1abf   :  { %v2182_v60 = vsel %vm1779_vm6, %v2180_v13, 0.0 }
0x1ac0   :  { %v2181_v52 = vsel %vm1777_vm5, %v2179_v25, 0.0  ;;  %vm2199_vm5 = vcmask 8192  }
0x1ac1   :  { %2156 = vadd.xlane.f32.xlu1 %v2155_v14  ;;  %v2183_v27 = vadd.f32 %v2182_v60, %v2181_v52 }
0x1ac5   :  { %2184 = vadd.xlane.f32.xlu1 %v2183_v27 }
0x1b42   :  { %v2073_v16 = vpop.xlane.xlu1 %2072 }
0x1b43   :  { %v2074_v29 = vrot.slane %v2073_v16, 4 }
0x1b44   :  { %v2101_v31 = vpop.xlane.xlu0 %2100 }
0x1b45   :  { %v2075_v33 = vadd.f32 %v2074_v29, %v2073_v16  ;;  %v2102_v18 = vrot.slane %v2101_v31, 4 }
0x1b46   :  { %v2129_v35 = vpop.xlane.xlu1 %2128 }
0x1b47   :  { %v2076_v19 = vrot.slane %v2075_v33, 2  ;;  %v2103_v37 = vadd.f32 %v2102_v18, %v2101_v31  ;;  %v2130_v15 = vrot.slane %v2129_v35, 4 }
0x1b49   :  { %v2104_v4 = vrot.slane %v2103_v37, 2  ;;  %v2131_v21 = vadd.f32 %v2130_v15, %v2129_v35  ;;  %v2077_v23 = vadd.f32 %v2076_v19, %v2075_v33 }
0x1b4a   :  { %v2157_v22 = vpop.xlane.xlu1 %2156 }
0x1b4b   :  { %v2105_v46 = vadd.f32 %v2104_v4, %v2103_v37  ;;  %v2132_v24 = vrot.slane %v2131_v21, 2  ;;  %v2158_v44 = vrot.slane %v2157_v22, 4  ;;  %v2078_v17 = vrot.slane %v2077_v23, 1 }
0x1b4d   :  { %v2159_v30 = vadd.f32 %v2158_v44, %v2157_v22  ;;  %v2079_v45 = vadd.f32 %v2078_v17, %v2077_v23  ;;  %v2106_v48 = vrot.slane %v2105_v46, 1  ;;  %v2133_v49 = vadd.f32 %v2132_v24, %v2131_v21 }
0x1b4e   :  { %v2185_v6 = vpop.xlane.xlu1 %2184 }
0x1b4f   :  { %v2160_v1 = vrot.slane %v2159_v30, 2  ;;  %v2186_v55 = vrot.slane %v2185_v6, 4  ;;  %2332 = vpush %v2079_v45  ;;  %v2107_v56 = vadd.f32 %v2106_v48, %v2105_v46  ;;  %v2134_v51 = vrot.slane %v2133_v49, 1 }
0x1b51   :  { %v2187_v38 = vadd.f32 %v2186_v55, %v2185_v6  ;;  %2334 = vpush %v2107_v56  ;;  %v2135_v2 = vadd.f32 %v2134_v51, %v2133_v49  ;;  %v2161_v59 = vadd.f32 %v2160_v1, %v2159_v30 }
0x1b53   :  { %v2188_v9 = vrot.slane %v2187_v38, 2  ;;  %2336 = vpush %v2135_v2  ;;  %v2162_v57 = vrot.slane %v2161_v59, 1 }
0x1b55   :  { %v2189_v62 = vadd.f32 %v2188_v9, %v2187_v38  ;;  %v2163_v63 = vadd.f32 %v2162_v57, %v2161_v59 }
0x1b57   :  { %2338 = vpush %v2163_v63  ;;  %v2190_v10 = vrot.slane %v2189_v62, 1 }
0x1b59   :  { %v2191_v5 = vadd.f32 %v2190_v10, %v2189_v62 }
0x1b5b   :  { %2340 = vpush %v2191_v5 }
0x1b80   :  { %s2333_s4 = spop %2332 }
0x1b81   :  { %v2082_v7 = vstv %s2333_s4 }
0x1b82   :  { %s2335_s24 = spop %2334  ;;  %v2083_v32 = vmul.f32 %v2082_v7, %v2081_v53 }
0x1b83   :  { %v2110_v50 = vstv %s2335_s24 }
0x1b84   :  { %v2111_v47 = vmul.f32 %v2110_v50, %v2109_v26  ;;  %s2337_s27 = spop %2336 }
0x1b85   :  { %v2138_v3 = vstv %s2337_s27 }
0x1b86   :  { %v2112_v0 = vadd.f32 %v2111_v47, %v2083_v32  ;;  %v2139_v8 = vmul.f32 %v2138_v3, %v2137_v58 }
0x1b88   :  { %s2339_s10 = spop %2338  ;;  %v2140_v39 = vadd.f32 %v2139_v8, %v2112_v0 }
0x1b89   :  { %v2166_v54 = vstv %s2339_s10 }
0x1b8a   :  { %v2167_v36 = vmul.f32 %v2166_v54, %v2165_v28 }
0x1b8c   :  { %s2341_s2 = spop %2340  ;;  %v2168_v34 = vadd.f32 %v2167_v36, %v2140_v39 }
0x1b8d   :  { %v2194_v61 = vstv %s2341_s2 }
0x1b8e   :  { %v2195_v20 = vmul.f32 %v2194_v61, %v2193_v12 }
0x1b90   :  { %v2196_v41 = vadd.f32 %v2195_v20, %v2168_v34 }
0x1b92   :  { %v2198_v42 = vadd.f32 %v2197_v40, %v2196_v41 }
0x1b94   :  { %2200 = vst.msk [vmem:[#allocation2] sm:$0x1] %vm2199_vm5, %v2198_v42 }
0x1b95   :  { %2504 = shalt.err (!%p2501_p4)
}
0x1b96   :  { %2210 = dma.vmem_to_hbm [thread:$0]  %s2208_s15, 16, %s3356_s8, [#allocation3]  }
0x1b97   :  { %2513 = dma.done.wait [#allocation3], 16  }
0x1b98   :  { %2514 = vsyncadd [#allocation3], 4294967280 }
0x1b99   :  { %2214 = vsyncpa [#allocation3], 1 }

</bundles_post_ra>
